<compile_context>
chip_gen: v7x
topology: tpu7x:2x2x1
jax: 0.10.0
libtpu: 0.0.40
codegen_flags: <defaults>
</compile_context>

<pallas_src>
import functools

import jax
import jax.numpy as jnp
from jax.experimental import pallas as pl
from jax.experimental.pallas import tpu as pltpu


def _round_up(v, m):
    return (v + m - 1) // m * m


# ------------------------------ Pallas kernel ------------------------------ #
def graph_gru_kernel(a_hbm, x0_hbm, h_ref, wbig_ref, whh_ref, b_ref,
                     o_ref, a_vmem, xh_scr, dma_sems, *, hp, dpad):
    """One grid step == one GRU layer.

    a_hbm   : [Np, Np]          A_hat (bf16) in HBM; copied to a_vmem ONCE
    x0_hbm  : [Np, Dp]          padded layer-0 input (bf16) in HBM; copied ONCE
    h_ref   : [1, Np, Hp]       h[l] (f32), pipelined per layer
    wbig_ref: [1, Dp+Hp, 3*Hp]  [[Wxz|Wxr|Wxh],[Whz|Whr|0]] (bf16)
    whh_ref : [1, Hp, Hp]       Whh (bf16)
    b_ref   : [1, 1, 3*Hp]      bx + bh for the 3 gate blocks (f32)
    o_ref   : [1, Np, Hp]       h_out[l] (f32); HBM buffer aliased with h
    a_vmem  : [Np, Np]          single VMEM-resident copy of A_hat (scratch)
    xh_scr  : [Np, Dp+Hp]       bf16 carry scratch holding [x_in | h[l]]
    dma_sems: DMA semaphores for the two one-time copies
    """
    l = pl.program_id(0)

    # One-time loads: exactly one VMEM buffer for A_hat (no double buffering),
    # and x0 lands directly in the x-columns of the carry scratch.
    @pl.when(l == 0)
    def _():
        cp_a = pltpu.make_async_copy(a_hbm, a_vmem, dma_sems.at[0])
        cp_x = pltpu.make_async_copy(x0_hbm, xh_scr.at[:, 0:dpad],
                                     dma_sems.at[1])
        cp_a.start()
        cp_x.start()
        cp_a.wait()
        cp_x.wait()

    Hi = h_ref[0, :, :]                                    # [Np, Hp] f32

    # Assemble the fused MXU RHS [x_in | h[l]] in the carry scratch.
    xh_scr[:, dpad:dpad + hp] = Hi.astype(xh_scr.dtype)

    A = a_vmem[...]                                        # bf16 [Np, Np]

    # Pass 1 over A: A @ [x_in | h] as one wide dot (Dp+Hp columns).
    axh = jnp.dot(A, xh_scr[...], preferred_element_type=jnp.float32)

    # One wide gate matmul covering all three x-paths and the z/r h-paths.
    gates = jnp.dot(axh.astype(wbig_ref.dtype), wbig_ref[0, :, :],
                    preferred_element_type=jnp.float32) + b_ref[0]   # [Np, 3Hp]

    z = jax.nn.sigmoid(gates[:, 0:hp])
    r = jax.nn.sigmoid(gates[:, hp:2 * hp])

    # Pass 2 over A: candidate state needs A @ (r * h)  (r depends on pass 1).
    rh = (r * Hi).astype(A.dtype)
    arh = jnp.dot(A, rh, preferred_element_type=jnp.float32)
    h_tilde = jnp.tanh(gates[:, 2 * hp:3 * hp]
                       + jnp.dot(arh.astype(whh_ref.dtype), whh_ref[0, :, :],
                                 preferred_element_type=jnp.float32))

    out = z * Hi + (1.0 - z) * h_tilde                     # f32 gate math
    o_ref[0, :, :] = out

    # Carry: this layer's output is the next layer's GCN x-input.  Columns
    # hp:dpad (if any) keep stale layer-0 data, but they multiply zero weight
    # rows for l >= 1, so they cannot affect the result.
    xh_scr[:, 0:hp] = out.astype(xh_scr.dtype)


# ----------------------------- host-side packing ---------------------------- #
def pack_params(params, *, hidden_size, mxu_dtype=jnp.bfloat16):
    """Pack per-layer GCN weights into stacked MXU-friendly arrays.

    Runs OUTSIDE the jitted forward (review: the previous per-call scatter
    loop emitted O(L*6) scatter HLOs before every launch).  Gate blocks are
    128-lane padded so every kernel slice/store stays aligned.
    """
    H = hidden_size
    Hp = _round_up(H, 128)
    din0 = params[0][0].shape[0]
    Dp = max(_round_up(din0, 128), Hp)

    wbig_l, whh_l, b_l = [], [], []
    for (wx, wh, bx, bh) in params:
        din = wx.shape[0]
        # x-path rows [0:Dp): three gate blocks, each padded H -> Hp.
        wx_blk = jnp.concatenate(
            [jnp.pad(wx[:, g * H:(g + 1) * H], ((0, Dp - din), (0, Hp - H)))
             for g in range(3)], axis=1)                        # [Dp, 3Hp]
        # h-path rows [Dp:Dp+Hp): z and r blocks (Whh acts on r*h separately).
        wh_blk = jnp.concatenate(
            [jnp.pad(wh[:, g * H:(g + 1) * H], ((0, Hp - H), (0, Hp - H)))
             for g in range(2)]
            + [jnp.zeros((Hp, Hp), wh.dtype)], axis=1)          # [Hp, 3Hp]
        wbig_l.append(jnp.concatenate([wx_blk, wh_blk], axis=0))
        whh_l.append(jnp.pad(wh[:, 2 * H:3 * H], ((0, Hp - H), (0, Hp - H))))
        b_l.append(jnp.concatenate(
            [jnp.pad(bx[:, g * H:(g + 1) * H] + bh[:, g * H:(g + 1) * H],
                     ((0, 0), (0, Hp - H))) for g in range(3)], axis=1))

    wbig = jnp.stack(wbig_l).astype(mxu_dtype)                  # [L, Dp+Hp, 3Hp]
    whh = jnp.stack(whh_l).astype(mxu_dtype)                    # [L, Hp, Hp]
    ball = jnp.stack(b_l).astype(jnp.float32)                   # [L, 1, 3Hp]
    return wbig, whh, ball


def build_norm_adj(edge_index, num_nodes):
    """Dense D^{-1/2}(A+I)D^{-1/2}; scatter-ADD of edges like PyG gcn_norm."""
    src, dst = edge_index[0], edge_index[1]
    adj = jnp.zeros((num_nodes, num_nodes), jnp.float32)
    adj = adj.at[dst, src].add(1.0)                        # duplicates accumulate
    adj = adj + jnp.eye(num_nodes, dtype=jnp.float32)      # additive self-loops
    deg = adj.sum(axis=1)
    dinv = jnp.where(deg > 0.0, jax.lax.rsqrt(deg), 0.0)
    return dinv[:, None] * adj * dinv[None, :]


def _vmem_capacity_bytes():
    """Physical per-core VMEM; conservative 64 MiB (v7x) if query unavailable."""
    try:
        info = pltpu.get_tpu_info()
        cap = getattr(info, "vmem_capacity_bytes", None)
        if cap:
            return int(cap)
    except Exception:
        pass
    return 64 * 1024 * 1024


# -------------------------------- forward ----------------------------------- #
def graph_gru_forward(x, edge_index, h, wbig, whh, ball, *, hidden_size,
                      mxu_dtype=jnp.bfloat16):
    """x: [N, Din], edge_index: [2, E] int32, h: [L, N, H]  ->  [L, N, H]."""
    N, din0 = x.shape
    L = h.shape[0]
    H = hidden_size

    Np = _round_up(N, 128)                  # lane-dense A, full MXU contraction
    Hp = _round_up(H, 128)                  # lane-dense gates / output stores
    Gp = wbig.shape[2]                      # 3*Hp
    Cw = wbig.shape[1]                      # Dp + Hp
    Dp = Cw - Hp
    assert Gp == 3 * Hp and Dp >= din0 and wbig.shape[0] == L

    a_hat = build_norm_adj(edge_index, N)
    a_p = jnp.zeros((Np, Np), jnp.float32).at[:N, :N].set(a_hat).astype(mxu_dtype)
    x_p = jnp.zeros((Np, Dp), jnp.float32).at[:N, :din0].set(
        x.astype(jnp.float32)).astype(mxu_dtype)
    h_p = jnp.zeros((L, Np, Hp), jnp.float32).at[:, :N, :H].set(
        h.astype(jnp.float32))

    # ---- VMEM budget: resident scratch + double-buffered per-layer blocks
    # ---- + f32 compute temporaries + bf16 MXU casts, clamped to chip VMEM.
    isz = jnp.dtype(mxu_dtype).itemsize
    resident = Np * Np * isz + Np * Cw * isz                    # a_vmem + xh_scr
    per_layer_blk = (Np * Hp * 4            # h[l]
                     + Cw * Gp * isz        # wbig[l]
                     + Hp * Hp * isz        # whh[l]
                     + Gp * 4               # bias[l]
                     + Np * Hp * 4)         # out[l]
    temps = (Np * Cw * 4 + Np * Gp * 4 + 6 * Np * Hp * 4        # axh, gates, z/r/arh/ht/out/Hi
             + Np * Cw * isz + 2 * Np * Hp * isz)               # bf16 casts feeding MXU
    need = resident + 2 * per_layer_blk + temps + (2 << 20)
    cap = _vmem_capacity_bytes()
    vmem_limit = int(min(max(need, 8 << 20), cap - (4 << 20)))

    kern = functools.partial(graph_gru_kernel, hp=Hp, dpad=Dp)
    h_out_p = pl.pallas_call(
        kern,
        grid=(L,),
        in_specs=[
            pl.BlockSpec(memory_space=pl.ANY),                 # A_hat: HBM, copied once
            pl.BlockSpec(memory_space=pl.ANY),                 # x0:    HBM, copied once
            pl.BlockSpec((1, Np, Hp), lambda l: (l, 0, 0)),    # h[l]
            pl.BlockSpec((1, Cw, Gp), lambda l: (l, 0, 0)),    # wbig[l]
            pl.BlockSpec((1, Hp, Hp), lambda l: (l, 0, 0)),    # whh[l]
            pl.BlockSpec((1, 1, Gp), lambda l: (l, 0, 0)),     # bias[l]
        ],
        out_specs=pl.BlockSpec((1, Np, Hp), lambda l: (l, 0, 0)),
        out_shape=jax.ShapeDtypeStruct((L, Np, Hp), jnp.float32),
        scratch_shapes=[
            pltpu.VMEM((Np, Np), mxu_dtype),                   # resident A_hat
            pltpu.VMEM((Np, Cw), mxu_dtype),                   # [x_in | h] carry
            pltpu.SemaphoreType.DMA((2,)),
        ],
        input_output_aliases={2: 0},                           # h buffer -> h_out
        compiler_params=pltpu.CompilerParams(
            dimension_semantics=("arbitrary",),    # layer axis carries state
            vmem_limit_bytes=vmem_limit),
    )(a_p, x_p, h_p, wbig, whh, ball)

    return h_out_p[:, :N, :H]


# --------------------------- init & pure-JAX reference ---------------------- #
def init_params(key, input_size, hidden_size, layer_num):
    """Deterministic glorot-ish weights; per-layer concat [z | r | h] gates."""
    params = []
    for i in range(layer_num):
        din = input_size if i == 0 else hidden_size
        key, k1, k2, k3, k4 = jax.random.split(key, 5)
        sx = (6.0 / (din + hidden_size)) ** 0.5
        sh = (6.0 / (hidden_size + hidden_size)) ** 0.5
        wx = jax.random.uniform(k1, (din, 3 * hidden_size), jnp.float32, -sx, sx)
        wh = jax.random.uniform(k2, (hidden_size, 3 * hidden_size), jnp.float32, -sh, sh)
        bx = 0.1 * jax.random.normal(k3, (1, 3 * hidden_size), jnp.float32)
        bh = 0.1 * jax.random.normal(k4, (1, 3 * hidden_size), jnp.float32)
        params.append((wx, wh, bx, bh))
    return params


def graph_gru_reference(x, edge_index, h, params, *, hidden_size):
    """Pure f32 reference, six GCNs per layer (module semantics)."""
    a_hat = build_norm_adj(edge_index, x.shape[0])
    H = hidden_size

    def gcn(inp, w, b):
        return a_hat @ (inp @ w) + b

    outs = []
    x_in = x.astype(jnp.float32)
    for i in range(h.shape[0]):
        wx, wh, bx, bh = params[i]
        hi = h[i]
        z = jax.nn.sigmoid(gcn(x_in, wx[:, 0:H], bx[:, 0:H])
                           + gcn(hi, wh[:, 0:H], bh[:, 0:H]))
        r = jax.nn.sigmoid(gcn(x_in, wx[:, H:2 * H], bx[:, H:2 * H])
                           + gcn(hi, wh[:, H:2 * H], bh[:, H:2 * H]))
        h_tilde = jnp.tanh(gcn(x_in, wx[:, 2 * H:], bx[:, 2 * H:])
                           + gcn(r * hi, wh[:, 2 * H:], bh[:, 2 * H:]))
        out = z * hi + (1.0 - z) * h_tilde
        outs.append(out)
        x_in = out
    return jnp.stack(outs, axis=0)


# ----------------------------------- main ----------------------------------- #
if __name__ == "__main__":
    NUM_NODES = 16
    INPUT_SIZE = 8
    HIDDEN_SIZE = 32
    LAYER_NUM = 2
    NUM_EDGES = 40

    key = jax.random.PRNGKey(0)
    kx, kh, ke, kp = jax.random.split(key, 4)

    x = jax.random.normal(kx, (NUM_NODES, INPUT_SIZE), jnp.float32)
    h = jax.random.normal(kh, (LAYER_NUM, NUM_NODES, HIDDEN_SIZE), jnp.float32)
    edge_index = jax.random.randint(ke, (2, NUM_EDGES), 0, NUM_NODES, jnp.int32)

    params = init_params(kp, INPUT_SIZE, HIDDEN_SIZE, LAYER_NUM)
    # Weight packing is done ONCE, outside the jitted forward (review item 8).
    wbig, whh, ball = pack_params(params, hidden_size=HIDDEN_SIZE,
                                  mxu_dtype=jnp.bfloat16)

    fwd = jax.jit(functools.partial(graph_gru_forward,
                                    hidden_size=HIDDEN_SIZE,
                                    mxu_dtype=jnp.bfloat16))
    h_out = jax.block_until_ready(fwd(x, edge_index, h, wbig, whh, ball))

    h_ref = graph_gru_reference(x, edge_index, h, params,
                                hidden_size=HIDDEN_SIZE)

    assert h_out.shape == (LAYER_NUM, NUM_NODES, HIDDEN_SIZE)
    # bf16 MXU operands (f32 accumulation + f32 gate math) vs pure-f32 reference
    # -> expected deviations are O(1e-2); any structural bug is O(1).
    assert jnp.allclose(h_out, h_ref, atol=1.5e-1, rtol=1e-1), (
        "max |diff| = %f" % float(jnp.max(jnp.abs(h_out - h_ref))))

    print("KERNEL_OK")
</pallas_src>

<mosaic_0001>
module attributes {stable_mosaic.version = 11 : i64} {
  func.func @graph_gru_kernel(%arg0: i32, %arg1: memref<128x128xbf16, #tpu.memory_space<any>>, %arg2: memref<128x128xbf16, #tpu.memory_space<any>>, %arg3: memref<1x128x128xf32, #tpu.memory_space<vmem>>, %arg4: memref<1x256x384xbf16, #tpu.memory_space<vmem>>, %arg5: memref<1x128x128xbf16, #tpu.memory_space<vmem>>, %arg6: memref<1x1x384xf32, #tpu.memory_space<vmem>>, %arg7: memref<1x128x128xf32, #tpu.memory_space<vmem>>, %arg8: memref<128x128xbf16, #tpu.memory_space<vmem>>, %arg9: memref<128x256xbf16, #tpu.memory_space<vmem>>, %arg10: memref<2x!tpu.dma_semaphore, #tpu.memory_space<semaphore_mem>>) attributes {dimension_semantics = [#tpu.dimension_semantics<arbitrary>], iteration_bounds = array<i64: 2>, scalar_prefetch = 0 : i64, scratch_operands = 3 : i64, tpu.core_type = #tpu.core_type<tc>, window_params = [{}, {}, {transform_indices = @transform_2, window_bounds = array<i64: 1, 128, 128>}, {transform_indices = @transform_3, window_bounds = array<i64: 1, 256, 384>}, {transform_indices = @transform_4, window_bounds = array<i64: 1, 128, 128>}, {transform_indices = @transform_5, window_bounds = array<i64: 1, 1, 384>}, {transform_indices = @transform_6, window_bounds = array<i64: 1, 128, 128>}]} {
    %c0_i32 = arith.constant 0 : i32
    %0 = arith.cmpi eq, %arg0, %c0_i32 : i32
    %1 = arith.extui %0 : i1 to i32
    %c0_i32_0 = arith.constant 0 : i32
    %2 = arith.cmpi ne, %1, %c0_i32_0 : i32
    scf.if %2 {
      %c0_i32_28 = arith.constant 0 : i32
      %50 = tpu.memref_slice %arg10[%c0_i32_28] : memref<2x!tpu.dma_semaphore, #tpu.memory_space<semaphore_mem>> -> memref<1x!tpu.dma_semaphore, #tpu.memory_space<semaphore_mem>>
      %51 = tpu.memref_squeeze %50 : memref<1x!tpu.dma_semaphore, #tpu.memory_space<semaphore_mem>> -> memref<!tpu.dma_semaphore, #tpu.memory_space<semaphore_mem>>
      tpu.enqueue_dma source(%arg1 : memref<128x128xbf16, #tpu.memory_space<any>>) target(%arg8 : memref<128x128xbf16, #tpu.memory_space<vmem>>) target_semaphore(%51 : memref<!tpu.dma_semaphore, #tpu.memory_space<semaphore_mem>>)
      %c1_i32 = arith.constant 1 : i32
      %c0_i32_29 = arith.constant 0 : i32
      %c0_i32_30 = arith.constant 0 : i32
      %52 = tpu.memref_slice %arg9[%c0_i32_29, %c0_i32_30] : memref<128x256xbf16, #tpu.memory_space<vmem>> -> memref<128x128xbf16, #tpu.memory_space<vmem>>
      %53 = tpu.memref_slice %arg10[%c1_i32] : memref<2x!tpu.dma_semaphore, #tpu.memory_space<semaphore_mem>> -> memref<1x!tpu.dma_semaphore, #tpu.memory_space<semaphore_mem>>
      %54 = tpu.memref_squeeze %53 : memref<1x!tpu.dma_semaphore, #tpu.memory_space<semaphore_mem>> -> memref<!tpu.dma_semaphore, #tpu.memory_space<semaphore_mem>>
      tpu.enqueue_dma source(%arg2 : memref<128x128xbf16, #tpu.memory_space<any>>) target(%52 : memref<128x128xbf16, #tpu.memory_space<vmem>>) target_semaphore(%54 : memref<!tpu.dma_semaphore, #tpu.memory_space<semaphore_mem>>)
      %c0_i32_31 = arith.constant 0 : i32
      %55 = tpu.memref_slice %arg10[%c0_i32_31] : memref<2x!tpu.dma_semaphore, #tpu.memory_space<semaphore_mem>> -> memref<1x!tpu.dma_semaphore, #tpu.memory_space<semaphore_mem>>
      %56 = tpu.memref_squeeze %55 : memref<1x!tpu.dma_semaphore, #tpu.memory_space<semaphore_mem>> -> memref<!tpu.dma_semaphore, #tpu.memory_space<semaphore_mem>>
      tpu.wait_dma2 semaphore(%56 : memref<!tpu.dma_semaphore, #tpu.memory_space<semaphore_mem>>) src(%arg1 : memref<128x128xbf16, #tpu.memory_space<any>>) dst(%arg8 : memref<128x128xbf16, #tpu.memory_space<vmem>>)
      %c1_i32_32 = arith.constant 1 : i32
      %c0_i32_33 = arith.constant 0 : i32
      %c0_i32_34 = arith.constant 0 : i32
      %57 = tpu.memref_slice %arg9[%c0_i32_33, %c0_i32_34] : memref<128x256xbf16, #tpu.memory_space<vmem>> -> memref<128x128xbf16, #tpu.memory_space<vmem>>
      %58 = tpu.memref_slice %arg10[%c1_i32_32] : memref<2x!tpu.dma_semaphore, #tpu.memory_space<semaphore_mem>> -> memref<1x!tpu.dma_semaphore, #tpu.memory_space<semaphore_mem>>
      %59 = tpu.memref_squeeze %58 : memref<1x!tpu.dma_semaphore, #tpu.memory_space<semaphore_mem>> -> memref<!tpu.dma_semaphore, #tpu.memory_space<semaphore_mem>>
      tpu.wait_dma2 semaphore(%59 : memref<!tpu.dma_semaphore, #tpu.memory_space<semaphore_mem>>) src(%arg2 : memref<128x128xbf16, #tpu.memory_space<any>>) dst(%57 : memref<128x128xbf16, #tpu.memory_space<vmem>>)
    } else {
    }
    %c0 = arith.constant 0 : index
    %c0_1 = arith.constant 0 : index
    %c0_2 = arith.constant 0 : index
    %3 = vector.load %arg3[%c0, %c0_1, %c0_2] : memref<1x128x128xf32, #tpu.memory_space<vmem>>, vector<1x128x128xf32>
    %4 = vector.shape_cast %3 : vector<1x128x128xf32> to vector<128x128xf32>
    %5 = arith.truncf %4 : vector<128x128xf32> to vector<128x128xbf16>
    %c0_3 = arith.constant 0 : index
    %c128 = arith.constant 128 : index
    %6 = vector.load %arg9[%c0_3, %c128] : memref<128x256xbf16, #tpu.memory_space<vmem>>, vector<128x128xbf16>
    tpu.vector_store %arg9[%c0_3, %c128], %5 {strides = array<i32>} : memref<128x256xbf16, #tpu.memory_space<vmem>>, vector<128x128xbf16>,
    %c0_4 = arith.constant 0 : index
    %c0_5 = arith.constant 0 : index
    %7 = vector.load %arg8[%c0_4, %c0_5] : memref<128x128xbf16, #tpu.memory_space<vmem>>, vector<128x128xbf16>
    %c0_6 = arith.constant 0 : index
    %c0_7 = arith.constant 0 : index
    %8 = vector.load %arg9[%c0_6, %c0_7] : memref<128x256xbf16, #tpu.memory_space<vmem>>, vector<128x256xbf16>
    %cst = arith.constant dense<0.000000e+00> : vector<128x256xf32>
    %9 = tpu.matmul %7, %8, %cst {dimension_numbers = #tpu.dot_dimension_numbers<[1], [0], [0], [1], [0, 0, 1, 1], [], []>} : vector<128x128xbf16>, vector<128x256xbf16>, vector<128x256xf32> -> vector<128x256xf32>
    %10 = arith.truncf %9 : vector<128x256xf32> to vector<128x256xbf16>
    %c0_8 = arith.constant 0 : index
    %c0_9 = arith.constant 0 : index
    %c0_10 = arith.constant 0 : index
    %11 = vector.load %arg4[%c0_8, %c0_9, %c0_10] : memref<1x256x384xbf16, #tpu.memory_space<vmem>>, vector<1x256x384xbf16>
    %12 = vector.shape_cast %11 : vector<1x256x384xbf16> to vector<256x384xbf16>
    %cst_11 = arith.constant dense<0.000000e+00> : vector<128x384xf32>
    %13 = tpu.matmul %10, %12, %cst_11 {dimension_numbers = #tpu.dot_dimension_numbers<[1], [0], [0], [1], [0, 0, 1, 1], [], []>} : vector<128x256xbf16>, vector<256x384xbf16>, vector<128x384xf32> -> vector<128x384xf32>
    %c0_12 = arith.constant 0 : index
    %c0_13 = arith.constant 0 : index
    %c0_14 = arith.constant 0 : index
    %14 = vector.load %arg6[%c0_12, %c0_13, %c0_14] : memref<1x1x384xf32, #tpu.memory_space<vmem>>, vector<1x1x384xf32>
    %15 = vector.shape_cast %14 : vector<1x1x384xf32> to vector<1x384xf32>
    %16 = vector.broadcast %15 : vector<1x384xf32> to vector<128x384xf32>
    %17 = arith.addf %13, %16 : vector<128x384xf32>
    %18 = vector.extract_strided_slice %17 {offsets = [0, 0], sizes = [128, 128], strides = [1, 1]} : vector<128x384xf32> to vector<128x128xf32>
    %19 = arith.negf %18 : vector<128x128xf32>
    %20 = math.exp %19 : vector<128x128xf32>
    %cst_15 = arith.constant 1.000000e+00 : f32
    %21 = vector.broadcast %cst_15 : f32 to vector<128x128xf32>
    %22 = arith.addf %21, %20 : vector<128x128xf32>
    %23 = arith.divf %21, %22 : vector<128x128xf32>
    %24 = vector.extract_strided_slice %17 {offsets = [0, 128], sizes = [128, 128], strides = [1, 1]} : vector<128x384xf32> to vector<128x128xf32>
    %25 = arith.negf %24 : vector<128x128xf32>
    %26 = math.exp %25 : vector<128x128xf32>
    %cst_16 = arith.constant 1.000000e+00 : f32
    %27 = vector.broadcast %cst_16 : f32 to vector<128x128xf32>
    %28 = arith.addf %27, %26 : vector<128x128xf32>
    %29 = arith.divf %27, %28 : vector<128x128xf32>
    %30 = arith.mulf %29, %4 : vector<128x128xf32>
    %31 = arith.truncf %30 : vector<128x128xf32> to vector<128x128xbf16>
    %cst_17 = arith.constant dense<0.000000e+00> : vector<128x128xf32>
    %32 = tpu.matmul %7, %31, %cst_17 {dimension_numbers = #tpu.dot_dimension_numbers<[1], [0], [0], [1], [0, 0, 1, 1], [], []>} : vector<128x128xbf16>, vector<128x128xbf16>, vector<128x128xf32> -> vector<128x128xf32>
    %33 = vector.extract_strided_slice %17 {offsets = [0, 256], sizes = [128, 128], strides = [1, 1]} : vector<128x384xf32> to vector<128x128xf32>
    %34 = arith.truncf %32 : vector<128x128xf32> to vector<128x128xbf16>
    %c0_18 = arith.constant 0 : index
    %c0_19 = arith.constant 0 : index
    %c0_20 = arith.constant 0 : index
    %35 = vector.load %arg5[%c0_18, %c0_19, %c0_20] : memref<1x128x128xbf16, #tpu.memory_space<vmem>>, vector<1x128x128xbf16>
    %36 = vector.shape_cast %35 : vector<1x128x128xbf16> to vector<128x128xbf16>
    %cst_21 = arith.constant dense<0.000000e+00> : vector<128x128xf32>
    %37 = tpu.matmul %34, %36, %cst_21 {dimension_numbers = #tpu.dot_dimension_numbers<[1], [0], [0], [1], [0, 0, 1, 1], [], []>} : vector<128x128xbf16>, vector<128x128xbf16>, vector<128x128xf32> -> vector<128x128xf32>
    %38 = arith.addf %33, %37 : vector<128x128xf32>
    %39 = math.tanh %38 : vector<128x128xf32>
    %40 = arith.mulf %23, %4 : vector<128x128xf32>
    %cst_22 = arith.constant 1.000000e+00 : f32
    %41 = vector.broadcast %cst_22 : f32 to vector<128x128xf32>
    %42 = arith.subf %41, %23 : vector<128x128xf32>
    %43 = arith.mulf %42, %39 : vector<128x128xf32>
    %44 = arith.addf %40, %43 : vector<128x128xf32>
    %c0_23 = arith.constant 0 : index
    %c0_24 = arith.constant 0 : index
    %c0_25 = arith.constant 0 : index
    %45 = vector.load %arg7[%c0_23, %c0_24, %c0_25] : memref<1x128x128xf32, #tpu.memory_space<vmem>>, vector<1x128x128xf32>
    %46 = vector.shape_cast %45 : vector<1x128x128xf32> to vector<128x128xf32>
    %47 = vector.shape_cast %44 : vector<128x128xf32> to vector<1x128x128xf32>
    tpu.vector_store %arg7[%c0_23, %c0_24, %c0_25], %47 {strides = array<i32>} : memref<1x128x128xf32, #tpu.memory_space<vmem>>, vector<1x128x128xf32>,
    %48 = arith.truncf %44 : vector<128x128xf32> to vector<128x128xbf16>
    %c0_26 = arith.constant 0 : index
    %c0_27 = arith.constant 0 : index
    %49 = vector.load %arg9[%c0_26, %c0_27] : memref<128x256xbf16, #tpu.memory_space<vmem>>, vector<128x128xbf16>
    tpu.vector_store %arg9[%c0_26, %c0_27], %48 {strides = array<i32>} : memref<128x256xbf16, #tpu.memory_space<vmem>>, vector<128x128xbf16>,
    return
  }
  func.func @transform_2(%arg0: i32) -> (i32, i32, i32) {
    %c0_i32 = arith.constant 0 : i32
    %c0_i32_0 = arith.constant 0 : i32
    %c0_i32_1 = arith.constant 0 : i32
    return %arg0, %c0_i32, %c0_i32_0 : i32, i32, i32
  }
  func.func @transform_3(%arg0: i32) -> (i32, i32, i32) {
    %c0_i32 = arith.constant 0 : i32
    %c0_i32_0 = arith.constant 0 : i32
    %c0_i32_1 = arith.constant 0 : i32
    return %arg0, %c0_i32, %c0_i32_0 : i32, i32, i32
  }
  func.func @transform_4(%arg0: i32) -> (i32, i32, i32) {
    %c0_i32 = arith.constant 0 : i32
    %c0_i32_0 = arith.constant 0 : i32
    %c0_i32_1 = arith.constant 0 : i32
    return %arg0, %c0_i32, %c0_i32_0 : i32, i32, i32
  }
  func.func @transform_5(%arg0: i32) -> (i32, i32, i32) {
    %c0_i32 = arith.constant 0 : i32
    %c0_i32_0 = arith.constant 0 : i32
    %c0_i32_1 = arith.constant 0 : i32
    return %arg0, %c0_i32, %c0_i32_0 : i32, i32, i32
  }
  func.func @transform_6(%arg0: i32) -> (i32, i32, i32) {
    %c0_i32 = arith.constant 0 : i32
    %c0_i32_0 = arith.constant 0 : i32
    %c0_i32_1 = arith.constant 0 : i32
    return %arg0, %c0_i32, %c0_i32_0 : i32, i32, i32
  }
}

</mosaic_0001>

<bundles_post_ra>
// kernel: graph_gru_forward.1
= control target key start
LH: loop header
LB: loop body
LE: loop exit
PB: predicated region body
PF: predicated region fallthrough
CT: control target
= control target key end

     0   :  { %s2448_s21 = smov 0   ;;  %s2984_s0 = inlined_call_operand.vmem [shape: bf16[128,128], index: 0, kind: input, shape index: {}]   ;;  %s2985_s1 = inlined_call_operand.vmem [shape: bf16[128,128], index: 1, kind: input, shape index: {}]   ;;  %s2986_s2 = inlined_call_operand.vmem [shape: f32[2,128,128], index: 2, kind: input, shape index: {}, may-alias: {2,6}]   ;;  %s2987_s3 = inlined_call_operand.vmem [shape: bf16[2,256,384], index: 3, kind: input, shape index: {}]   ;;  %s2988_s4 = inlined_call_operand.vmem [shape: bf16[2,128,128], index: 4, kind: input, shape index: {}]   ;;  %s2989_s5 = inlined_call_operand.vmem [shape: f32[2,1,384], index: 5, kind: input, shape index: {}]   ;;  %s2990_s6 = inlined_call_operand.vmem [shape: f32[2,128,128], index: 6, kind: output, shape index: {}, may-alias: {2,6}]  }
   0x1 LB: > { %s1857_s22 = sadd.s32 4294967295, %s2410_s21   ;;  %p1861_p0 = scmp.ge.s32.totalorder %s2410_s21, 1  ;;  %s2410_s21 = sphi %s2448_s21, %s16_s21  }
   0x2   : > { %p193_p1 = scmp.lt.s32.totalorder %s2410_s21, 3 }
   0x4   : > { %p194_p2 = pnand %p1861_p0, %p193_p1 }
   0x6   : > { %197 = sbr.rel (%p194_p2) target bundleno = 1072 (0x430), region = 36 }
   0xd   : > { %p233_p3 = scmp.lt.s32.totalorder %s1857_s22, 1  ;;  %p1869_p4 = scmp.ne.s32.totalorder %s1857_s22, 0 }
   0xe   : > { %v294_v0 = vld [vmem:[%s2984_s0] sm:$0xff] (!%p1869_p4)  ;;  %v296_v1 = vld [vmem:[%s2984_s0 + $0x8] sm:$0xff] (!%p1869_p4)  ;;  %v298_v2 = vld [vmem:[%s2984_s0 + $0x10] sm:$0xff] (!%p1869_p4) }
   0xf   : > { %s234_s23 = scalar_select %p233_p3, %s1857_s22, 1 }
  0x10   : > { %261 = sbr.rel (%p1869_p4) target bundleno = 33 (0x21), region = 40  ;;  %295 = vst [vmem:[#allocation2] sm:$0xff] (!%p1869_p4), %v294_v0  ;;  %297 = vst [vmem:[#allocation2 + $0x8] sm:$0xff] (!%p1869_p4), %v296_v1  ;;  %v300_v3 = vld [vmem:[%s2984_s0 + $0x18] sm:$0xff] (!%p1869_p4)  ;;  %v302_v4 = vld [vmem:[%s2984_s0 + $0x20] sm:$0xff] (!%p1869_p4) }
  0x11   : > { %s1962_s24 = sshll.u32 %s234_s23, 7  ;;  %s2141_s25 = smul.u32 384, %s234_s23  ;;  %299 = vst [vmem:[#allocation2 + $0x10] sm:$0xff] (!%p1869_p4), %v298_v2  ;;  %v304_v5 = vld [vmem:[%s2984_s0 + $0x28] sm:$0xff] (!%p1869_p4)  ;;  %301 = vst [vmem:[#allocation2 + $0x18] sm:$0xff] (!%p1869_p4), %v300_v3  ;;  %v306_v6 = vld [vmem:[%s2984_s0 + $0x30] sm:$0xff] (!%p1869_p4) }
  0x12   : > { %s2459_s28 = scalar_lea.vmem %s2986_s2, %s1962_s24  ;;  %s1963_s29 = sshll.u32 %s234_s23, 6  ;;  %303 = vst [vmem:[#allocation2 + $0x20] sm:$0xff] (!%p1869_p4), %v302_v4  ;;  %305 = vst [vmem:[#allocation2 + $0x28] sm:$0xff] (!%p1869_p4), %v304_v5  ;;  %v308_v7 = vld [vmem:[%s2984_s0 + $0x38] sm:$0xff] (!%p1869_p4) }
  0x13   : > { %s2464_s8 = scalar_lea.vmem %s2987_s3, %s2141_s25  ;;  %s2469_s11 = scalar_lea.vmem %s2988_s4, %s1963_s29  ;;  %307 = vst [vmem:[#allocation2 + $0x30] sm:$0xff] (!%p1869_p4), %v306_v6  ;;  %309 = vst [vmem:[#allocation2 + $0x38] sm:$0xff] (!%p1869_p4), %v308_v7 }
  0x14   : > { %s2142_s12 = smul.u32 3, %s234_s23  ;;  %s2474_s15 = scalar_lea.vmem %s2990_s6, %s1962_s24 }
  0x16   : > { %s2479_s18 = scalar_lea.vmem %s2989_s5, %s2142_s12 }
  0x17   : > { %317 = vsyncadd [#allocation4], 1024  ;;  %v365_v8 = vld [vmem:[%s2985_s1] sm:$0xff]  ;;  %v367_v9 = vld [vmem:[%s2985_s1 + $0x8] sm:$0xff] }
  0x18   : > { %366 = vst [vmem:[#allocation3] sm:$0xff] %v365_v8  ;;  %368 = vst [vmem:[#allocation3 + $0x10] sm:$0xff] %v367_v9  ;;  %v369_v10 = vld [vmem:[%s2985_s1 + $0x10] sm:$0xff]  ;;  %v371_v11 = vld [vmem:[%s2985_s1 + $0x18] sm:$0xff] }
  0x19   : > { %v373_v12 = vld [vmem:[%s2985_s1 + $0x20] sm:$0xff]  ;;  %370 = vst [vmem:[#allocation3 + $0x20] sm:$0xff] %v369_v10  ;;  %372 = vst [vmem:[#allocation3 + $0x30] sm:$0xff] %v371_v11  ;;  %v375_v13 = vld [vmem:[%s2985_s1 + $0x28] sm:$0xff] }
  0x1a   : > { %374 = vst [vmem:[#allocation3 + $0x40] sm:$0xff] %v373_v12  ;;  %v377_v14 = vld [vmem:[%s2985_s1 + $0x30] sm:$0xff]  ;;  %v379_v15 = vld [vmem:[%s2985_s1 + $0x38] sm:$0xff]  ;;  %376 = vst [vmem:[#allocation3 + $0x50] sm:$0xff] %v375_v13 }
  0x1b   : > { %378 = vst [vmem:[#allocation3 + $0x60] sm:$0xff] %v377_v14  ;;  %380 = vst [vmem:[#allocation3 + $0x70] sm:$0xff] %v379_v15 }
  0x1c   : > { %388 = vsyncadd [#allocation4 + $0x1], 1024 }
  0x1d   : > { %2404 = dma.done.wait [#allocation4], 1024 }
  0x1e   : > { %2405 = vsyncadd [#allocation4], 4294966272 }
  0x1f   : > { %2406 = dma.done.wait [#allocation4 + $0x1], 1024 }
  0x20   : > { %2407 = vsyncadd [#allocation4 + $0x1], 4294966272 }
  0x21 PF: > { %v2530_v16 = vld [vmem:[%s2459_s28] sm:$0xff]  ;;  %v2533_v17 = vld [vmem:[%s2459_s28 + $0x8] sm:$0xff]  ;;  %v2538_v20 = vld [vmem:[%s2459_s28 + $0x10] sm:$0xff]  ;;  %v2412_v22 = vmov 0  }
  0x22   : > { %v411_v18 = vpack.c.bf16 %v2533_v17, %v2530_v16  ;;  %v435_v19 = vld [vmem:[#allocation3] sm:$0xff]  ;;  %v2541_v21 = vld [vmem:[%s2459_s28 + $0x18] sm:$0xff]  ;;  %483 = vmatprep.mubr.bf16.mxu0 %v2412_v22  ;;  %v2550_v25 = vld [vmem:[%s2459_s28 + $0x28] sm:$0xff] }
  0x23   : > { %v412_v23 = vpack.c.bf16 %v2541_v21, %v2538_v20  ;;  %v2547_v24 = vld [vmem:[%s2459_s28 + $0x20] sm:$0xff]  ;;  %v401_v27 = vld [vmem:[%s2459_s28 + $0x30] sm:$0xff]  ;;  %v402_v28 = vld [vmem:[%s2459_s28 + $0x38] sm:$0xff] }
  0x24   : > { %451 = vmatprep.subr.bf16.mxu0 %v411_v18  ;;  %v413_v26 = vpack.c.bf16 %v2550_v25, %v2547_v24  ;;  %v414_v29 = vpack.c.bf16 %v402_v28, %v401_v27  ;;  %v403_v30 = vld [vmem:[%s2459_s28 + $0x40] sm:$0xff]  ;;  %v404_v31 = vld [vmem:[%s2459_s28 + $0x48] sm:$0xff]  ;;  %v437_v32 = vld [vmem:[#allocation3 + $0x10] sm:$0xff] }
  0x25   : > { %452 = vmatpush1.bf16.msra.mxu0 %v435_v19  ;;  %v415_v33 = vpack.c.bf16 %v404_v31, %v403_v30  ;;  %v405_v34 = vld [vmem:[%s2459_s28 + $0x50] sm:$0xff]  ;;  %v406_v35 = vld [vmem:[%s2459_s28 + $0x58] sm:$0xff]  ;;  %v407_v37 = vld [vmem:[%s2459_s28 + $0x60] sm:$0xff] }
  0x26   : > { %453 = vmatprep.subr.bf16.mxu0 %v412_v23  ;;  %v416_v36 = vpack.c.bf16 %v406_v35, %v405_v34  ;;  %v408_v38 = vld [vmem:[%s2459_s28 + $0x68] sm:$0xff]  ;;  %v409_v40 = vld [vmem:[%s2459_s28 + $0x70] sm:$0xff]  ;;  %v410_v41 = vld [vmem:[%s2459_s28 + $0x78] sm:$0xff] }
  0x27   : > { %v417_v39 = vpack.c.bf16 %v408_v38, %v407_v37  ;;  %v418_v42 = vpack.c.bf16 %v410_v41, %v409_v40  ;;  %v439_v43 = vld [vmem:[#allocation3 + $0x20] sm:$0xff]  ;;  %v2155_v46 = vld [vmem:[%s2464_s8 + $0x1c] ss:$12 sps:$4 sm:$0xff]   ;;  %v441_v47 = vld [vmem:[#allocation3 + $0x30] sm:$0xff] }
  0x28   : > { %v2152_v44 = vld [vmem:[%s2464_s8 + $0x4] ss:$12 sps:$4 sm:$0xff]   ;;  %v2154_v45 = vld [vmem:[%s2464_s8] ss:$12 sps:$4 sm:$0xff]   ;;  %v2163_v54 = vld [vmem:[%s2464_s8 + $0x48] ss:$12 sps:$4 sm:$0xff]  }
  0x29   : > { %454 = vmatpush1.bf16.msra.mxu0 %v437_v32  ;;  %917 = vmatprep.subr.bf16.mxu1 %v2152_v44  ;;  %v2157_v48 = vld [vmem:[%s2464_s8 + $0x18] ss:$12 sps:$4 sm:$0xff]   ;;  %v2158_v49 = vld [vmem:[%s2464_s8 + $0x34] ss:$12 sps:$4 sm:$0xff]   ;;  %v2160_v51 = vld [vmem:[%s2464_s8 + $0x30] ss:$12 sps:$4 sm:$0xff]  }
  0x2a   : > { %455 = vmatprep.subr.bf16.mxu0 %v413_v26  ;;  %918 = vmatpush1.bf16.msra.mxu1 %v2154_v45  ;;  %v443_v50 = vld [vmem:[#allocation3 + $0x40] sm:$0xff]  ;;  %v2161_v52 = vld [vmem:[%s2464_s8 + $0x4c] ss:$12 sps:$4 sm:$0xff]   ;;  %v445_v53 = vld [vmem:[#allocation3 + $0x50] sm:$0xff] }
  0x2b   : > { %919 = vmatprep.subr.bf16.mxu1 %v2155_v46  ;;  %v2164_v55 = vld [vmem:[%s2464_s8 + $0x64] ss:$12 sps:$4 sm:$0xff]   ;;  %v2166_v57 = vld [vmem:[%s2464_s8 + $0x60] ss:$12 sps:$4 sm:$0xff]   ;;  %v2167_v58 = vld [vmem:[%s2464_s8 + $0x7c] ss:$12 sps:$4 sm:$0xff]  }
  0x2c   : > { %v447_v56 = vld [vmem:[#allocation3 + $0x60] sm:$0xff]  ;;  %v449_v59 = vld [vmem:[#allocation3 + $0x70] sm:$0xff]  ;;  %v2173_v3 = vld [vmem:[%s2464_s8 + $0xac] ss:$12 sps:$4 sm:$0xff]  }
  0x2d   : > { %456 = vmatpush1.bf16.msra.mxu0 %v439_v43  ;;  %v2178_v60 = vld [vmem:[%s2464_s8 + $0xc8] ss:$12 sps:$4 sm:$0xff]   ;;  %v2576_v61 = vld [vmem:[#allocation2] sm:$0xff]  ;;  %v2172_v2 = vld [vmem:[%s2464_s8 + $0x90] ss:$12 sps:$4 sm:$0xff]  }
  0x2e   : > { %457 = vmatprep.subr.bf16.mxu0 %v414_v29  ;;  %920 = vmatpush1.bf16.msra.mxu1 %v2157_v48  ;;  %v2169_v62 = vld [vmem:[%s2464_s8 + $0x78] ss:$12 sps:$4 sm:$0xff]   ;;  %v2170_v63 = vld [vmem:[%s2464_s8 + $0x94] ss:$12 sps:$4 sm:$0xff]   ;;  %v2588_v6 = vld [vmem:[#allocation2 + $0x8] sm:$0xff] }
  0x2f   : > { %921 = vmatprep.subr.bf16.mxu1 %v2158_v49  ;;  %v2180_v0 = vld [vmem:[%s2464_s8 + $0x8] ss:$12 sps:$4 sm:$0xff]   ;;  %v2183_v1 = vld [vmem:[%s2464_s8 + $0xe0] ss:$12 sps:$4 sm:$0xff]   ;;  %v2188_v5 = vld [vmem:[%s2464_s8 + $0xf8] ss:$12 sps:$4 sm:$0xff]  }
  0x30   : > { %v2185_v4 = vld [vmem:[%s2464_s8 + $0x20] ss:$12 sps:$4 sm:$0xff]   ;;  %v2175_v7 = vld [vmem:[%s2464_s8 + $0xa8] ss:$12 sps:$4 sm:$0xff]   ;;  %v2176_v8 = vld [vmem:[%s2464_s8 + $0xc4] ss:$12 sps:$4 sm:$0xff]  }
  0x31   : > { %458 = vmatpush1.bf16.msra.mxu0 %v441_v47  ;;  %v2179_v9 = vld [vmem:[%s2464_s8 + $0xc0] ss:$12 sps:$4 sm:$0xff]   ;;  %v2190_v10 = vld [vmem:[%s2464_s8 + $0x38] ss:$12 sps:$4 sm:$0xff]   ;;  %v2181_v11 = vld [vmem:[%s2464_s8 + $0xdc] ss:$12 sps:$4 sm:$0xff]  }
  0x32   : > { %459 = vmatprep.subr.bf16.mxu0 %v415_v33  ;;  %922 = vmatpush1.bf16.msra.mxu1 %v2160_v51  ;;  %v2193_v12 = vld [vmem:[%s2464_s8 + $0x110] ss:$12 sps:$4 sm:$0xff]   ;;  %v2198_v14 = vld [vmem:[%s2464_s8 + $0x128] ss:$12 sps:$4 sm:$0xff]   ;;  %v2184_v15 = vld [vmem:[%s2464_s8 + $0xd8] ss:$12 sps:$4 sm:$0xff]  }
  0x33   : > { %923 = vmatprep.subr.bf16.mxu1 %v2161_v52  ;;  %v2195_v13 = vld [vmem:[%s2464_s8 + $0x50] ss:$12 sps:$4 sm:$0xff]   ;;  %v2186_v18 = vld [vmem:[%s2464_s8 + $0xf4] ss:$12 sps:$4 sm:$0xff]   ;;  %v2191_v28 = vld [vmem:[%s2464_s8 + $0x10c] ss:$12 sps:$4 sm:$0xff]  }
  0x34   : > { %v2602_v19 = vld [vmem:[#allocation2 + $0x10] sm:$0xff]  ;;  %v2203_v26 = vld [vmem:[%s2464_s8 + $0x140] ss:$12 sps:$4 sm:$0xff]   ;;  %v2208_v30 = vld [vmem:[%s2464_s8 + $0x158] ss:$12 sps:$4 sm:$0xff]  }
  0x35   : > { %460 = vmatpush1.bf16.msra.mxu0 %v443_v50  ;;  %v2200_v23 = vld [vmem:[%s2464_s8 + $0x68] ss:$12 sps:$4 sm:$0xff]   ;;  %v2189_v27 = vld [vmem:[%s2464_s8 + $0xf0] ss:$12 sps:$4 sm:$0xff]   ;;  %v2205_v29 = vld [vmem:[%s2464_s8 + $0x80] ss:$12 sps:$4 sm:$0xff]  }
  0x36   : > { %461 = vmatprep.subr.bf16.mxu0 %v416_v36  ;;  %924 = vmatpush1.bf16.msra.mxu1 %v2163_v54  ;;  %v2194_v31 = vld [vmem:[%s2464_s8 + $0x108] ss:$12 sps:$4 sm:$0xff]   ;;  %v2196_v32 = vld [vmem:[%s2464_s8 + $0x124] ss:$12 sps:$4 sm:$0xff]   ;;  %v2614_v33 = vld [vmem:[#allocation2 + $0x18] sm:$0xff] }
  0x37   : > { %925 = vmatprep.subr.bf16.mxu1 %v2164_v55  ;;  %v2199_v34 = vld [vmem:[%s2464_s8 + $0x120] ss:$12 sps:$4 sm:$0xff]   ;;  %v2201_v35 = vld [vmem:[%s2464_s8 + $0x13c] ss:$12 sps:$4 sm:$0xff]   ;;  %v2204_v36 = vld [vmem:[%s2464_s8 + $0x138] ss:$12 sps:$4 sm:$0xff]  }
  0x38   : > { %v2206_v37 = vld [vmem:[%s2464_s8 + $0x154] ss:$12 sps:$4 sm:$0xff]   ;;  %v2634_v41 = vld [vmem:[#allocation2 + $0x38] sm:$0xff] }
  0x39   : > { %462 = vmatpush1.bf16.msra.mxu0 %v445_v53  ;;  %v2622_v38 = vld [vmem:[#allocation2 + $0x20] sm:$0xff]  ;;  %v2630_v40 = vld [vmem:[#allocation2 + $0x30] sm:$0xff]  ;;  %v2211_v44 = vld [vmem:[%s2464_s8 + $0x16c] ss:$12 sps:$4 sm:$0xff]  }
  0x3a   : > { %463 = vmatprep.subr.bf16.mxu0 %v417_v39  ;;  %926 = vmatpush1.bf16.msra.mxu1 %v2166_v57  ;;  %v2626_v39 = vld [vmem:[#allocation2 + $0x28] sm:$0xff]  ;;  %v2210_v43 = vld [vmem:[%s2464_s8 + $0x98] ss:$12 sps:$4 sm:$0xff]   ;;  %v2213_v45 = vld [vmem:[%s2464_s8 + $0x170] ss:$12 sps:$4 sm:$0xff]  }
  0x3b   : > { %927 = vmatprep.subr.bf16.mxu1 %v2167_v58  ;;  %v2214_v46 = vld [vmem:[%s2464_s8 + $0x168] ss:$12 sps:$4 sm:$0xff]   ;;  %v2215_v47 = vld [vmem:[%s2464_s8 + $0xb0] ss:$12 sps:$4 sm:$0xff]  }
  0x3d   : > { %464 = vmatpush1.bf16.msra.mxu0 %v447_v56 }
  0x3e   : > { %465 = vmatprep.subr.bf16.mxu0 %v418_v42  ;;  %928 = vmatpush1.bf16.msra.mxu1 %v2169_v62  ;;  %v2209_v42 = vld [vmem:[%s2464_s8 + $0x150] ss:$12 sps:$4 sm:$0xff]  }
  0x3f   : > { %929 = vmatprep.subr.bf16.mxu1 %v2170_v63 }
  0x41   : > { %466 = vmatpush1.bf16.msra.mxu0 %v449_v59 }
  0x42   : > { %1965 = vmatprep.subr.bf16.mxu0 %v2178_v60  ;;  %930 = vmatpush1.bf16.msra.mxu1 %v2172_v2 }
  0x43   : > { %931 = vmatprep.subr.bf16.mxu1 %v2173_v3 }
  0x44   : > { %484 = vmatmul.mubr.bf16.vlgmr.msra.gmra.mrb[0].mxu0 %v2576_v61 }
  0x45   : > { %493 = vmatprep.mubr.bf16.mxu0 %v2412_v22  ;;  %1966 = vmatpush3.bf16.msra.mxu0 %v2180_v0 }
  0x46   : > { %1967 = vmatprep.subr.bf16.mxu0 %v2183_v1  ;;  %932 = vmatpush1.bf16.msra.mxu1 %v2175_v7 }
  0x47   : > { %933 = vmatprep.subr.bf16.mxu1 %v2176_v8 }
  0x49   : > { %1968 = vmatpush3.bf16.msra.mxu0 %v2185_v4 }
  0x4a   : > { %1969 = vmatprep.subr.bf16.mxu0 %v2188_v5  ;;  %934 = vmatpush1.bf16.msra.mxu1 %v2179_v9 }
  0x4b   : > { %935 = vmatprep.subr.bf16.mxu1 %v2181_v11 }
  0x4c   : > { %494 = vmatmul.mubr.bf16.gmra.mrb[4].mxu0 %v2588_v6 }
  0x4d   : > { %503 = vmatprep.mubr.bf16.mxu0 %v2412_v22  ;;  %1970 = vmatpush3.bf16.msra.mxu0 %v2190_v10 }
  0x4e   : > { %1971 = vmatprep.subr.bf16.mxu0 %v2193_v12  ;;  %936 = vmatpush1.bf16.msra.mxu1 %v2184_v15 }
  0x4f   : > { %937 = vmatprep.subr.bf16.mxu1 %v2186_v18 }
  0x51   : > { %1972 = vmatpush3.bf16.msra.mxu0 %v2195_v13 }
  0x52   : > { %1973 = vmatprep.subr.bf16.mxu0 %v2198_v14  ;;  %938 = vmatpush1.bf16.msra.mxu1 %v2189_v27 }
  0x53   : > { %939 = vmatprep.subr.bf16.mxu1 %v2191_v28 }
  0x54   : > { %504 = vmatmul.mubr.bf16.gmra.mrb[8].mxu0 %v2602_v19 }
  0x55   : > { %513 = vmatprep.mubr.bf16.mxu0 %v2412_v22  ;;  %1974 = vmatpush3.bf16.msra.mxu0 %v2200_v23 }
  0x56   : > { %1975 = vmatprep.subr.bf16.mxu0 %v2203_v26  ;;  %940 = vmatpush1.bf16.msra.mxu1 %v2194_v31 }
  0x57   : > { %941 = vmatprep.subr.bf16.mxu1 %v2196_v32 }
  0x59   : > { %1976 = vmatpush3.bf16.msra.mxu0 %v2205_v29 }
  0x5a   : > { %1977 = vmatprep.subr.bf16.mxu0 %v2208_v30  ;;  %942 = vmatpush1.bf16.msra.mxu1 %v2199_v34 }
  0x5b   : > { %943 = vmatprep.subr.bf16.mxu1 %v2201_v35 }
  0x5c   : > { %514 = vmatmul.mubr.bf16.gmra.mrb[12].mxu0 %v2614_v33 }
  0x5d   : > { %523 = vmatprep.mubr.bf16.mxu0 %v2412_v22  ;;  %1978 = vmatpush3.bf16.msra.mxu0 %v2210_v43 }
  0x5e   : > { %944 = vmatpush1.bf16.msra.mxu1 %v2204_v36  ;;  %1979 = vmatprep.subr.bf16.mxu0 %v2213_v45 }
  0x5f   : > { %945 = vmatprep.subr.bf16.mxu1 %v2206_v37 }
  0x61   : > { %1980 = vmatpush3.bf16.msra.mxu0 %v2215_v47 }
  0x62   : > { %946 = vmatpush1.bf16.msra.mxu1 %v2209_v42 }
  0x63   : > { %947 = vmatprep.subr.bf16.mxu1 %v2211_v44 }
  0x64   : > { %524 = vmatmul.mubr.bf16.gmra.mrb[16].mxu0 %v2622_v38 }
  0x65   : > { %533 = vmatprep.mubr.bf16.mxu0 %v2412_v22 }
  0x66   : > { %948 = vmatpush1.bf16.msra.mxu1 %v2214_v46  ;;  %v646_v46 = vlaneseq }
  0x68   : > { %v2644_v47 = vshrl.u32 %v646_v46, 7 }
  0x6c   : > { %534 = vmatmul.mubr.bf16.gmra.mrb[20].mxu0 %v2626_v39 }
  0x6d   : > { %543 = vmatprep.mubr.bf16.mxu0 %v2412_v22 }
  0x74   : > { %544 = vmatmul.mubr.bf16.gmra.mrb[24].mxu0 %v2630_v40 }
  0x75   : > { %553 = vmatprep.mubr.bf16.mxu0 %v2412_v22 }
  0x7c   : > { %554 = vmatmul.mubr.bf16.gmra.mrb[28].mxu0 %v2634_v41 }
 0x117   : > { %v485_v48 = vpop.f32.mrb[0].mxu0 }
 0x118   : > { %v487_v49 = vpop.f32.mrb[1].mxu0 }
 0x119   : > { %v489_v50 = vpop.f32.mrb[2].mxu0 }
 0x11a   : > { %v564_v22 = vpack.c.bf16 %v489_v50, %v485_v48  ;;  %v491_v51 = vpop.f32.mrb[3].mxu0  ;;  %v652_v48 = vsub.s32 1, %v2644_v47  ;;  %v2651_v50 = vld [vmem:[%s2469_s11] sm:$0xff]  }
 0x11b   : > { %v565_v52 = vpack.c.bf16 %v491_v51, %v487_v49  ;;  %v2648_v49 = vld [vmem:[%s2479_s18] sm:$0x7]  ;;  %2093 = vmatprep.subr.bf16.mxu0 %v2651_v50 }
 0x11c   : > { %v2658_v51 = vrot.slane %v2648_v49, %v652_v48 }
 0x11d   : > { %949 = vmatprep.mubr.bf16.mxu1 %v565_v52  ;;  %1062 = vmatprep.mubr.bf16.mxu0 %v565_v52 }
 0x11e   : > { %950 = vmatmul.mubr.bf16.vlgmr.msra.gmra.mrb[0].mxu1 %v564_v22  ;;  %1063 = vmatmul.mubr.bf16.vlgmr.msra.gmra.mrb[32].mxu0 %v564_v22  ;;  %v2654_v22 = vld [vmem:[%s2469_s11 + $0x8] sm:$0xff]  }
 0x11f   : > { %v495_v53 = vpop.f32.mrb[4].mxu0  ;;  %2094 = vmatpush3.bf16.msra.mxu0 %v2651_v50 }
 0x120   : > { %v497_v54 = vpop.f32.mrb[5].mxu0  ;;  %2095 = vmatprep.subr.bf16.mxu0 %v2654_v22 }
 0x121   : > { %v499_v55 = vpop.f32.mrb[6].mxu0 }
 0x122   : > { %v566_v56 = vpack.c.bf16 %v499_v55, %v495_v53  ;;  %v501_v57 = vpop.f32.mrb[7].mxu0 }
 0x123   : > { %v567_v58 = vpack.c.bf16 %v501_v57, %v497_v54  ;;  %2096 = vmatpush3.bf16.msra.mxu0 %v2654_v22 }
 0x125   : > { %959 = vmatprep.mubr.bf16.mxu1 %v567_v58  ;;  %1070 = vmatprep.mubr.bf16.mxu0 %v567_v58 }
 0x126   : > { %960 = vmatmul.mubr.bf16.gmra.mrb[4].mxu1 %v566_v56  ;;  %1071 = vmatmul.mubr.bf16.gmra.mrb[36].mxu0 %v566_v56 }
 0x127   : > { %v505_v59 = vpop.f32.mrb[8].mxu0 }
 0x128   : > { %v507_v60 = vpop.f32.mrb[9].mxu0 }
 0x129   : > { %v509_v62 = vpop.f32.mrb[10].mxu0 }
 0x12a   : > { %v568_v63 = vpack.c.bf16 %v509_v62, %v505_v59  ;;  %v511_v0 = vpop.f32.mrb[11].mxu0 }
 0x12b   : > { %v569_v1 = vpack.c.bf16 %v511_v0, %v507_v60 }
 0x12d   : > { %969 = vmatprep.mubr.bf16.mxu1 %v569_v1  ;;  %1078 = vmatprep.mubr.bf16.mxu0 %v569_v1 }
 0x12e   : > { %970 = vmatmul.mubr.bf16.gmra.mrb[8].mxu1 %v568_v63  ;;  %1079 = vmatmul.mubr.bf16.gmra.mrb[40].mxu0 %v568_v63  ;;  %v2675_v63 = vld [vmem:[%s2469_s11 + $0x18] sm:$0xff]  }
 0x12f   : > { %v515_v2 = vpop.f32.mrb[12].mxu0 }
 0x130   : > { %v517_v3 = vpop.f32.mrb[13].mxu0 }
 0x131   : > { %v519_v4 = vpop.f32.mrb[14].mxu0 }
 0x132   : > { %v570_v5 = vpack.c.bf16 %v519_v4, %v515_v2  ;;  %v521_v7 = vpop.f32.mrb[15].mxu0  ;;  %v2683_v4 = vld [vmem:[%s2469_s11 + $0x20] sm:$0xff]  }
 0x133   : > { %v571_v8 = vpack.c.bf16 %v521_v7, %v517_v3 }
 0x135   : > { %979 = vmatprep.mubr.bf16.mxu1 %v571_v8  ;;  %1086 = vmatprep.mubr.bf16.mxu0 %v571_v8 }
 0x136   : > { %980 = vmatmul.mubr.bf16.gmra.mrb[12].mxu1 %v570_v5  ;;  %1087 = vmatmul.mubr.bf16.gmra.mrb[44].mxu0 %v570_v5 }
 0x137   : > { %v525_v9 = vpop.f32.mrb[16].mxu0 }
 0x138   : > { %v527_v10 = vpop.f32.mrb[17].mxu0 }
 0x139   : > { %v529_v11 = vpop.f32.mrb[18].mxu0 }
 0x13a   : > { %v572_v12 = vpack.c.bf16 %v529_v11, %v525_v9  ;;  %v531_v13 = vpop.f32.mrb[19].mxu0 }
 0x13b   : > { %v573_v14 = vpack.c.bf16 %v531_v13, %v527_v10 }
 0x13d   : > { %989 = vmatprep.mubr.bf16.mxu1 %v573_v14  ;;  %1094 = vmatprep.mubr.bf16.mxu0 %v573_v14 }
 0x13e   : > { %990 = vmatmul.mubr.bf16.gmra.mrb[16].mxu1 %v572_v12  ;;  %1095 = vmatmul.mubr.bf16.gmra.mrb[48].mxu0 %v572_v12 }
 0x13f   : > { %v535_v15 = vpop.f32.mrb[20].mxu0 }
 0x140   : > { %v537_v18 = vpop.f32.mrb[21].mxu0 }
 0x141   : > { %v539_v23 = vpop.f32.mrb[22].mxu0 }
 0x142   : > { %v574_v26 = vpack.c.bf16 %v539_v23, %v535_v15  ;;  %v541_v27 = vpop.f32.mrb[23].mxu0 }
 0x143   : > { %v575_v28 = vpack.c.bf16 %v541_v27, %v537_v18  ;;  %v2695_v18 = vld [vmem:[%s2469_s11 + $0x28] sm:$0xff]  }
 0x145   : > { %999 = vmatprep.mubr.bf16.mxu1 %v575_v28  ;;  %1102 = vmatprep.mubr.bf16.mxu0 %v575_v28 }
 0x146   : > { %1000 = vmatmul.mubr.bf16.gmra.mrb[20].mxu1 %v574_v26  ;;  %1103 = vmatmul.mubr.bf16.gmra.mrb[52].mxu0 %v574_v26 }
 0x147   : > { %v545_v29 = vpop.f32.mrb[24].mxu0 }
 0x148   : > { %v547_v30 = vpop.f32.mrb[25].mxu0 }
 0x149   : > { %v549_v31 = vpop.f32.mrb[26].mxu0 }
 0x14a   : > { %v576_v32 = vpack.c.bf16 %v549_v31, %v545_v29  ;;  %v551_v34 = vpop.f32.mrb[27].mxu0  ;;  %v2703_v29 = vld [vmem:[%s2469_s11 + $0x30] sm:$0xff]  }
 0x14b   : > { %v577_v35 = vpack.c.bf16 %v551_v34, %v547_v30 }
 0x14d   : > { %1009 = vmatprep.mubr.bf16.mxu1 %v577_v35  ;;  %1110 = vmatprep.mubr.bf16.mxu0 %v577_v35 }
 0x14e   : > { %1010 = vmatmul.mubr.bf16.gmra.mrb[24].mxu1 %v576_v32  ;;  %1111 = vmatmul.mubr.bf16.gmra.mrb[56].mxu0 %v576_v32 }
 0x14f   : > { %v555_v36 = vpop.f32.mrb[28].mxu0 }
 0x150   : > { %v557_v37 = vpop.f32.mrb[29].mxu0 }
 0x151   : > { %v559_v42 = vpop.f32.mrb[30].mxu0 }
 0x152   : > { %v578_v43 = vpack.c.bf16 %v559_v42, %v555_v36  ;;  %v561_v44 = vpop.f32.mrb[31].mxu0 }
 0x153   : > { %v579_v45 = vpack.c.bf16 %v561_v44, %v557_v37 }
 0x155   : > { %1019 = vmatprep.mubr.bf16.mxu1 %v579_v45  ;;  %1118 = vmatprep.mubr.bf16.mxu0 %v579_v45 }
 0x156   : > { %1020 = vmatmul.mubr.bf16.gmra.mrb[28].mxu1 %v578_v43  ;;  %1119 = vmatmul.mubr.bf16.gmra.mrb[60].mxu0 %v578_v43 }
 0x157   : > { %2077 = vmatprep.mubr.bf16.mxu1 %v2576_v61  ;;  %v2663_v61 = vld [vmem:[%s2469_s11 + $0x10] sm:$0xff]  }
 0x158   : > { %2097 = vmatprep.subr.bf16.mxu0 %v2663_v61 }
 0x159   : > { %2098 = vmatpush3.bf16.msra.mxu0 %v2663_v61 }
 0x15a   : > { %2099 = vmatprep.subr.bf16.mxu0 %v2675_v63 }
 0x15d   : > { %2100 = vmatpush3.bf16.msra.mxu0 %v2675_v63 }
 0x15e   : > { %2101 = vmatprep.subr.bf16.mxu0 %v2683_v4 }
 0x161   : > { %2102 = vmatpush3.bf16.msra.mxu0 %v2683_v4 }
 0x162   : > { %2103 = vmatprep.subr.bf16.mxu0 %v2695_v18 }
 0x165   : > { %2104 = vmatpush3.bf16.msra.mxu0 %v2695_v18 }
 0x166   : > { %2105 = vmatprep.subr.bf16.mxu0 %v2703_v29 }
 0x169   : > { %2106 = vmatpush3.bf16.msra.mxu0 %v2703_v29 }
 0x1f1   : > { %v2665_v52 = vpop.f32.mrb[0].mxu1  ;;  %v1981_v53 = vpop.f32.mrb[32].mxu0 }
 0x1f2   : > { %v953_v54 = vpop.f32.mrb[1].mxu1  ;;  %v1982_v55 = vpop.f32.mrb[33].mxu0 }
 0x1f3   : > { %v954_v56 = vadd.f32 %v953_v54, %v2658_v51  ;;  %v2668_v57 = vadd.f32 %v1982_v55, %v1981_v53  ;;  %v2670_v58 = vpop.f32.mrb[2].mxu1  ;;  %v1984_v59 = vpop.f32.mrb[34].mxu0 }
 0x1f4   : > { %v957_v60 = vpop.f32.mrb[3].mxu1  ;;  %v1985_v62 = vpop.f32.mrb[35].mxu0 }
 0x1f5   : > { %v1934_v0 = vmul.f32 -1.442695, %v954_v56  ;;  %v958_v1 = vadd.f32 %v957_v60, %v2658_v51  ;;  %v2678_v2 = vadd.f32 %v1985_v62, %v1984_v59 }
 0x1f7   : > { %2224 = vpow2.f32 %v1934_v0  ;;  %v1935_v3 = vmul.f32 -1.442695, %v958_v1 }
 0x1f9   : > { %2226 = vpow2.f32 %v1935_v3  ;;  %v2685_v5 = vpop.f32.mrb[4].mxu1  ;;  %v1987_v7 = vpop.f32.mrb[36].mxu0 }
 0x1fa   : > { %v963_v8 = vpop.f32.mrb[5].mxu1  ;;  %v1988_v9 = vpop.f32.mrb[37].mxu0 }
 0x1fb   : > { %v964_v10 = vadd.f32 %v963_v8, %v2658_v51  ;;  %v2688_v11 = vadd.f32 %v1988_v9, %v1987_v7  ;;  %v2690_v12 = vpop.f32.mrb[6].mxu1  ;;  %v1990_v13 = vpop.f32.mrb[38].mxu0 }
 0x1fc   : > { %v967_v14 = vpop.f32.mrb[7].mxu1  ;;  %v1991_v15 = vpop.f32.mrb[39].mxu0 }
 0x1fd   : > { %v1936_v23 = vmul.f32 -1.442695, %v964_v10  ;;  %v968_v26 = vadd.f32 %v967_v14, %v2658_v51  ;;  %v2698_v27 = vadd.f32 %v1991_v15, %v1990_v13 }
 0x1ff   : > { %2228 = vpow2.f32 %v1936_v23  ;;  %v1937_v28 = vmul.f32 -1.442695, %v968_v26 }
 0x201   : > { %v2225_v30 = vpop.eup %2224  ;;  %2230 = vpow2.f32 %v1937_v28  ;;  %v2705_v31 = vpop.f32.mrb[8].mxu1 }
 0x202   : > { %v1993_v32 = vpop.f32.mrb[40].mxu0  ;;  %v1271_v34 = vadd.f32 1.0, %v2225_v30  ;;  %v973_v35 = vpop.f32.mrb[9].mxu1 }
 0x203   : > { %v1994_v36 = vpop.f32.mrb[41].mxu0  ;;  %v2227_v37 = vpop.eup %2226  ;;  %v974_v42 = vadd.f32 %v973_v35, %v2658_v51 }
 0x204   : > { %v2708_v43 = vadd.f32 %v1994_v36, %v1993_v32  ;;  %v2710_v44 = vpop.f32.mrb[10].mxu1  ;;  %v1996_v45 = vpop.f32.mrb[42].mxu0  ;;  %2232 = vrcp.f32 %v1271_v34  ;;  %v1272_v46 = vadd.f32 1.0, %v2227_v37 }
 0x205   : > { %v977_v48 = vpop.f32.mrb[11].mxu1  ;;  %v1997_v53 = vpop.f32.mrb[43].mxu0  ;;  %v1938_v54 = vmul.f32 -1.442695, %v974_v42 }
 0x206   : > { %v978_v55 = vadd.f32 %v977_v48, %v2658_v51  ;;  %v2715_v56 = vadd.f32 %v1997_v53, %v1996_v45  ;;  %2234 = vrcp.f32 %v1272_v46 }
 0x207   : > { %2236 = vpow2.f32 %v1938_v54 }
 0x208   : > { %v1939_v59 = vmul.f32 -1.442695, %v978_v55 }
 0x209   : > { %v2229_v60 = vpop.eup %2228  ;;  %v2718_v62 = vpop.f32.mrb[12].mxu1 }
 0x20a   : > { %v1999_v0 = vpop.f32.mrb[44].mxu0  ;;  %2238 = vpow2.f32 %v1939_v59  ;;  %v983_v1 = vpop.f32.mrb[13].mxu1  ;;  %v1273_v8 = vadd.f32 1.0, %v2229_v60 }
 0x20b   : > { %v2000_v3 = vpop.f32.mrb[45].mxu0  ;;  %v2231_v7 = vpop.eup %2230  ;;  %v984_v9 = vadd.f32 %v983_v1, %v2658_v51 }
 0x20c   : > { %v2721_v10 = vadd.f32 %v2000_v3, %v1999_v0  ;;  %v2723_v13 = vpop.f32.mrb[14].mxu1  ;;  %v2002_v14 = vpop.f32.mrb[46].mxu0  ;;  %v1274_v15 = vadd.f32 1.0, %v2231_v7 }
 0x20d   : > { %v987_v23 = vpop.f32.mrb[15].mxu1  ;;  %v2003_v26 = vpop.f32.mrb[47].mxu0  ;;  %v1940_v28 = vmul.f32 -1.442695, %v984_v9 }
 0x20e   : > { %v988_v30 = vadd.f32 %v987_v23, %v2658_v51  ;;  %v2726_v32 = vadd.f32 %v2003_v26, %v2002_v14  ;;  %v2233_v34 = vpop.eup %2232  ;;  %2240 = vrcp.f32 %v1274_v15 }
 0x20f   : > { %2242 = vrcp.f32 %v1273_v8  ;;  %v1319_v45 = vmul.f32 %v2233_v34, %v2530_v16 }
 0x210   : > { %v1941_v35 = vmul.f32 -1.442695, %v988_v30  ;;  %v2235_v36 = vpop.eup %2234  ;;  %2244 = vpow2.f32 %v1940_v28 }
 0x211   : > { %v2728_v37 = vpop.f32.mrb[16].mxu1  ;;  %v2005_v42 = vpop.f32.mrb[48].mxu0  ;;  %v1320_v46 = vmul.f32 %v2235_v36, %v2533_v17 }
 0x212   : > { %v2237_v48 = vpop.eup %2236  ;;  %2246 = vpow2.f32 %v1941_v35  ;;  %v993_v53 = vpop.f32.mrb[17].mxu1 }
 0x213   : > { %v2006_v54 = vpop.f32.mrb[49].mxu0  ;;  %v1275_v55 = vadd.f32 1.0, %v2237_v48  ;;  %v994_v59 = vadd.f32 %v993_v53, %v2658_v51  ;;  %v2735_v0 = vpop.f32.mrb[18].mxu1  ;;  %v1335_v3 = vpack.c.bf16 %v1320_v46, %v1319_v45 }
 0x214   : > { %v2733_v60 = vadd.f32 %v2006_v54, %v2005_v42  ;;  %v2008_v1 = vpop.f32.mrb[50].mxu0  ;;  %v2239_v7 = vpop.eup %2238 }
 0x215   : > { %v997_v8 = vpop.f32.mrb[19].mxu1  ;;  %v2009_v9 = vpop.f32.mrb[51].mxu0  ;;  %2248 = vrcp.f32 %v1275_v55  ;;  %v1276_v16 = vadd.f32 1.0, %v2239_v7  ;;  %v1942_v14 = vmul.f32 -1.442695, %v994_v59  ;;  %2061 = vmatprep.subr.bf16.mxu1 %v1335_v3 }
 0x216   : > { %v998_v17 = vadd.f32 %v997_v8, %v2658_v51  ;;  %v2738_v15 = vadd.f32 %v2009_v9, %v2008_v1  ;;  %2062 = vmatpush3.bf16.msra.mxu1 %v1335_v3 }
 0x217   : > { %2250 = vrcp.f32 %v1276_v16 }
 0x218   : > { %v1943_v23 = vmul.f32 -1.442695, %v998_v17  ;;  %v2241_v26 = vpop.eup %2240  ;;  %2252 = vpow2.f32 %v1942_v14 }
 0x219   : > { %v2243_v28 = vpop.eup %2242  ;;  %v2740_v30 = vpop.f32.mrb[20].mxu1  ;;  %v1322_v45 = vmul.f32 %v2241_v26, %v2541_v21 }
 0x21a   : > { %v2011_v34 = vpop.f32.mrb[52].mxu0  ;;  %v2245_v35 = vpop.eup %2244  ;;  %2254 = vpow2.f32 %v1943_v23  ;;  %v1321_v7 = vmul.f32 %v2243_v28, %v2538_v20 }
 0x21b   : > { %v1003_v36 = vpop.f32.mrb[21].mxu1  ;;  %v2012_v42 = vpop.f32.mrb[53].mxu0  ;;  %v1277_v59 = vadd.f32 1.0, %v2245_v35 }
 0x21c   : > { %v1004_v46 = vadd.f32 %v1003_v36, %v2658_v51  ;;  %v2744_v48 = vadd.f32 %v2012_v42, %v2011_v34  ;;  %v2746_v53 = vpop.f32.mrb[22].mxu1  ;;  %v2014_v54 = vpop.f32.mrb[54].mxu0  ;;  %v1336_v21 = vpack.c.bf16 %v1322_v45, %v1321_v7 }
 0x21d   : > { %v2247_v55 = vpop.eup %2246  ;;  %v1007_v1 = vpop.f32.mrb[23].mxu1 }
 0x21e   : > { %v2015_v3 = vpop.f32.mrb[55].mxu0  ;;  %v1278_v8 = vadd.f32 1.0, %v2247_v55  ;;  %v1944_v9 = vmul.f32 -1.442695, %v1004_v46  ;;  %v1008_v16 = vadd.f32 %v1007_v1, %v2658_v51  ;;  %2063 = vmatprep.subr.bf16.mxu1 %v1336_v21 }
 0x21f   : > { %v2750_v14 = vadd.f32 %v2015_v3, %v2014_v54  ;;  %v2249_v17 = vpop.eup %2248  ;;  %2064 = vmatpush3.bf16.msra.mxu1 %v1336_v21 }
 0x220   : > { %2256 = vrcp.f32 %v1278_v8  ;;  %v1945_v23 = vmul.f32 -1.442695, %v1008_v16  ;;  %v1323_v28 = vmul.f32 %v2249_v17, %v2547_v24 }
 0x221   : > { %2258 = vrcp.f32 %v1277_v59  ;;  %v2251_v26 = vpop.eup %2250  ;;  %v2752_v34 = vpop.f32.mrb[24].mxu1 }
 0x222   : > { %2260 = vpow2.f32 %v1944_v9  ;;  %v2017_v35 = vpop.f32.mrb[56].mxu0  ;;  %v1013_v36 = vpop.f32.mrb[25].mxu1  ;;  %v1324_v42 = vmul.f32 %v2251_v26, %v2550_v25 }
 0x223   : > { %v2018_v20 = vpop.f32.mrb[57].mxu0  ;;  %v2253_v46 = vpop.eup %2252  ;;  %2262 = vpow2.f32 %v1945_v23  ;;  %v1014_v45 = vadd.f32 %v1013_v36, %v2658_v51 }
 0x224   : > { %v2757_v54 = vadd.f32 %v2018_v20, %v2017_v35  ;;  %v2759_v55 = vpop.f32.mrb[26].mxu1  ;;  %v2020_v59 = vpop.f32.mrb[58].mxu0  ;;  %v1279_v1 = vadd.f32 1.0, %v2253_v46  ;;  %v1337_v8 = vpack.c.bf16 %v1324_v42, %v1323_v28 }
 0x225   : > { %v1017_v3 = vpop.f32.mrb[27].mxu1  ;;  %v2021_v7 = vpop.f32.mrb[59].mxu0  ;;  %v1946_v21 = vmul.f32 -1.442695, %v1014_v45 }
 0x226   : > { %2992 = vst [vmem:[#allocation9_spill] sm:$0xff] %v2757_v54  ;;  %v2255_v9 = vpop.eup %2254  ;;  %v1018_v16 = vadd.f32 %v1017_v3, %v2658_v51  ;;  %2264 = vrcp.f32 %v1279_v1  ;;  %v2762_v25 = vadd.f32 %v2021_v7, %v2020_v59  ;;  %2065 = vmatprep.subr.bf16.mxu1 %v1337_v8  ;;  %v2772_v3 = vld [vmem:[%s2459_s28 + $0x38] sm:$0xff] }
 0x227   : > { %v1280_v24 = vadd.f32 1.0, %v2255_v9  ;;  %2066 = vmatpush3.bf16.msra.mxu1 %v1337_v8  ;;  %2995 = vst [vmem:[#allocation12_spill] sm:$0xff] %v2772_v3 }
 0x228   : > { %2993 = vst [vmem:[#allocation10_spill] sm:$0xff] %v2762_v25  ;;  %v1947_v17 = vmul.f32 -1.442695, %v1018_v16  ;;  %v2777_v25 = vld [vmem:[%s2459_s28 + $0x30] sm:$0xff] }
 0x229   : > { %2266 = vrcp.f32 %v1280_v24  ;;  %v2764_v26 = vpop.f32.mrb[28].mxu1  ;;  %v2023_v35 = vpop.f32.mrb[60].mxu0 }
 0x22a   : > { %v2257_v23 = vpop.eup %2256  ;;  %2268 = vpow2.f32 %v1946_v21  ;;  %v1023_v20 = vpop.f32.mrb[29].mxu1 }
 0x22b   : > { %v2259_v36 = vpop.eup %2258  ;;  %v2024_v28 = vpop.f32.mrb[61].mxu0  ;;  %v1024_v46 = vadd.f32 %v1023_v20, %v2658_v51  ;;  %v1326_v7 = vmul.f32 %v2772_v3, %v2257_v23  ;;  %2270 = vpow2.f32 %v1947_v17  ;;  %v2783_v3 = vld [vmem:[%s2459_s28 + $0x40] sm:$0xff] }
 0x22c   : > { %v2261_v42 = vpop.eup %2260  ;;  %v2767_v45 = vadd.f32 %v2024_v28, %v2023_v35  ;;  %v2769_v59 = vpop.f32.mrb[30].mxu1  ;;  %v1325_v35 = vmul.f32 %v2777_v25, %v2259_v36 }
 0x22d   : > { %v2026_v1 = vpop.f32.mrb[62].mxu0  ;;  %v1281_v8 = vadd.f32 1.0, %v2261_v42  ;;  %v1027_v9 = vpop.f32.mrb[31].mxu1  ;;  %v1948_v28 = vmul.f32 -1.442695, %v1024_v46 }
 0x22e   : > { %2994 = vst [vmem:[#allocation11_spill] sm:$0xff] %v2767_v45  ;;  %v2027_v16 = vpop.f32.mrb[63].mxu0  ;;  %v2263_v24 = vpop.eup %2262  ;;  %v1028_v21 = vadd.f32 %v1027_v9, %v2658_v51  ;;  %v1338_v54 = vpack.c.bf16 %v1326_v7, %v1325_v35  ;;  %v2787_v9 = vld [vmem:[%s2459_s28 + $0x48] sm:$0xff] }
 0x22f   : > { %2272 = vrcp.f32 %v1281_v8  ;;  %v1282_v20 = vadd.f32 1.0, %v2263_v24  ;;  %v2780_v45 = vadd.f32 %v2027_v16, %v2026_v1 }
 0x230   : > { %v2265_v23 = vpop.eup %2264  ;;  %v1949_v17 = vmul.f32 -1.442695, %v1028_v21  ;;  %2067 = vmatprep.subr.bf16.mxu1 %v1338_v54  ;;  %v2791_v21 = vld [vmem:[%s2459_s28 + $0x50] sm:$0xff] }
 0x231   : > { %2274 = vrcp.f32 %v1282_v20  ;;  %2068 = vmatpush3.bf16.msra.mxu1 %v1338_v54  ;;  %v1327_v51 = vmul.f32 %v2783_v3, %v2265_v23  ;;  %v2795_v20 = vld [vmem:[%s2459_s28 + $0x58] sm:$0xff] }
 0x232   : > { %2276 = vpow2.f32 %v1948_v28 }
 0x233   : > { %v2267_v42 = vpop.eup %2266  ;;  %2278 = vpow2.f32 %v1949_v17 }
 0x234   : > { %v1328_v36 = vmul.f32 %v2787_v9, %v2267_v42  ;;  %v2269_v46 = vpop.eup %2268 }
 0x235   : > { %v1283_v1 = vadd.f32 1.0, %v2269_v46  ;;  %v2271_v8 = vpop.eup %2270 }
 0x236   : > { %v1339_v7 = vpack.c.bf16 %v1328_v36, %v1327_v51  ;;  %v1284_v16 = vadd.f32 1.0, %v2271_v8 }
 0x237   : > { %2280 = vrcp.f32 %v1283_v1 }
 0x238   : > { %2069 = vmatprep.subr.bf16.mxu1 %v1339_v7  ;;  %2282 = vrcp.f32 %v1284_v16  ;;  %v2803_v16 = vld [vmem:[%s2459_s28 + $0x68] sm:$0xff] }
 0x239   : > { %v2273_v24 = vpop.eup %2272  ;;  %2070 = vmatpush3.bf16.msra.mxu1 %v1339_v7  ;;  %v2799_v7 = vld [vmem:[%s2459_s28 + $0x60] sm:$0xff] }
 0x23a   : > { %v1329_v35 = vmul.f32 %v2791_v21, %v2273_v24 }
 0x23b   : > { %v2275_v54 = vpop.eup %2274 }
 0x23c   : > { %v1330_v28 = vmul.f32 %v2795_v20, %v2275_v54  ;;  %v2277_v23 = vpop.eup %2276 }
 0x23d   : > { %v1285_v17 = vadd.f32 1.0, %v2277_v23  ;;  %v2279_v51 = vpop.eup %2278  ;;  %v2807_v23 = vld [vmem:[%s2459_s28 + $0x70] sm:$0xff] }
 0x23e   : > { %v1340_v42 = vpack.c.bf16 %v1330_v28, %v1329_v35  ;;  %v1286_v36 = vadd.f32 1.0, %v2279_v51 }
 0x23f   : > { %2284 = vrcp.f32 %v1285_v17 }
 0x240   : > { %2071 = vmatprep.subr.bf16.mxu1 %v1340_v42  ;;  %2286 = vrcp.f32 %v1286_v36 }
 0x241   : > { %2072 = vmatpush3.bf16.msra.mxu1 %v1340_v42  ;;  %v2281_v46 = vpop.eup %2280  ;;  %v2811_v42 = vld [vmem:[%s2459_s28 + $0x78] sm:$0xff] }
 0x242   : > { %v2283_v1 = vpop.eup %2282  ;;  %v1331_v8 = vmul.f32 %v2799_v7, %v2281_v46 }
 0x243   : > { %v1332_v24 = vmul.f32 %v2803_v16, %v2283_v1 }
 0x245   : > { %v1341_v54 = vpack.c.bf16 %v1332_v24, %v1331_v8 }
 0x247   : > { %2073 = vmatprep.subr.bf16.mxu1 %v1341_v54 }
 0x248   : > { %2074 = vmatpush3.bf16.msra.mxu1 %v1341_v54 }
 0x249   : > { %v2285_v35 = vpop.eup %2284 }
 0x24a   : > { %v2287_v28 = vpop.eup %2286  ;;  %v1333_v17 = vmul.f32 %v2807_v23, %v2285_v35 }
 0x24b   : > { %v1334_v51 = vmul.f32 %v2811_v42, %v2287_v28 }
 0x24d   : > { %v1342_v36 = vpack.c.bf16 %v1334_v51, %v1333_v17 }
 0x24f   : > { %2075 = vmatprep.subr.bf16.mxu1 %v1342_v36 }
 0x250   : > { %2076 = vmatpush3.bf16.msra.mxu1 %v1342_v36 }
 0x251   : > { %2125 = vmatprep.subr.bf16.mxu1 %v2651_v50 }
 0x253   : > { %2078 = vmatmul.mubr.bf16.vlgmr.msra.gmra.mrb[32].mxu1 %v2588_v6  ;;  %v2223_v6 = vld [vmem:[%s2469_s11 + $0x38] sm:$0xff]  }
 0x254   : > { %2081 = vmatprep.mubr.bf16.mxu1 %v2602_v19  ;;  %2133 = vmatpush3.bf16.msra.mxu1 %v2651_v50 }
 0x255   : > { %2126 = vmatprep.subr.bf16.mxu1 %v2654_v22  ;;  %2107 = vmatprep.subr.bf16.mxu0 %v2223_v6 }
 0x256   : > { %2108 = vmatpush3.bf16.msra.mxu0 %v2223_v6 }
 0x258   : > { %2134 = vmatpush3.bf16.msra.mxu1 %v2654_v22 }
 0x259   : > { %2127 = vmatprep.subr.bf16.mxu1 %v2663_v61 }
 0x25b   : > { %2082 = vmatmul.mubr.bf16.gmra.mrb[36].mxu1 %v2614_v33 }
 0x25c   : > { %2085 = vmatprep.mubr.bf16.mxu1 %v2622_v38  ;;  %2135 = vmatpush3.bf16.msra.mxu1 %v2663_v61 }
 0x25d   : > { %2128 = vmatprep.subr.bf16.mxu1 %v2675_v63 }
 0x260   : > { %2136 = vmatpush3.bf16.msra.mxu1 %v2675_v63 }
 0x261   : > { %2129 = vmatprep.subr.bf16.mxu1 %v2683_v4 }
 0x263   : > { %2086 = vmatmul.mubr.bf16.gmra.mrb[40].mxu1 %v2626_v39 }
 0x264   : > { %2089 = vmatprep.mubr.bf16.mxu1 %v2630_v40  ;;  %2137 = vmatpush3.bf16.msra.mxu1 %v2683_v4 }
 0x265   : > { %2130 = vmatprep.subr.bf16.mxu1 %v2695_v18 }
 0x268   : > { %2138 = vmatpush3.bf16.msra.mxu1 %v2695_v18 }
 0x269   : > { %2131 = vmatprep.subr.bf16.mxu1 %v2703_v29 }
 0x26b   : > { %2090 = vmatmul.mubr.bf16.gmra.mrb[44].mxu1 %v2634_v41 }
 0x26c   : > { %2139 = vmatpush3.bf16.msra.mxu1 %v2703_v29 }
 0x26d   : > { %2132 = vmatprep.subr.bf16.mxu1 %v2223_v6 }
 0x270   : > { %2140 = vmatpush3.bf16.msra.mxu1 %v2223_v6 }
 0x326   : > { %v2079_v19 = vpop.f32.mrb[32].mxu1 }
 0x327   : > { %v1377_v33 = vpop.f32.mrb[33].mxu1 }
 0x328   : > { %v2080_v38 = vpop.f32.mrb[34].mxu1 }
 0x329   : > { %v1441_v39 = vpack.c.bf16 %v2080_v38, %v2079_v19  ;;  %v1380_v40 = vpop.f32.mrb[35].mxu1  ;;  %v648_v19 = vsub.s32 0, %v2644_v47 }
 0x32a   : > { %v1440_v50 = vpack.c.bf16 %v1380_v40, %v1377_v33 }
 0x32b   : > { %v2838_v33 = vrot.slane %v2648_v49, %v648_v19 }
 0x32c   : > { %2109 = vmatprep.mubr.bf16.mxu0 %v1440_v50 }
 0x32d   : > { %2110 = vmatmul.mubr.bf16.vlgmr.msra.gmra.mrb[64].mxu0 %v1441_v39  ;;  %v952_v38 = vadd.f32 %v2665_v52, %v2838_v33  ;;  %v956_v39 = vadd.f32 %v2670_v58, %v2838_v33  ;;  %v962_v40 = vadd.f32 %v2685_v5, %v2838_v33  ;;  %v966_v50 = vadd.f32 %v2690_v12, %v2838_v33 }
 0x32e   : > { %v2083_v22 = vpop.f32.mrb[36].mxu1  ;;  %v982_v5 = vadd.f32 %v2718_v62, %v2838_v33  ;;  %v986_v12 = vadd.f32 %v2723_v13, %v2838_v33  ;;  %v996_v13 = vadd.f32 %v2735_v0, %v2838_v33 }
 0x32f   : > { %v1393_v61 = vpop.f32.mrb[37].mxu1 }
 0x330   : > { %v2084_v63 = vpop.f32.mrb[38].mxu1 }
 0x331   : > { %v1443_v4 = vpack.c.bf16 %v2084_v63, %v2083_v22  ;;  %v1396_v41 = vpop.f32.mrb[39].mxu1  ;;  %v1918_v22 = vmul.f32 -1.442695, %v952_v38  ;;  %v1919_v63 = vmul.f32 -1.442695, %v956_v39 }
 0x332   : > { %v1442_v18 = vpack.c.bf16 %v1396_v41, %v1393_v61  ;;  %v972_v61 = vadd.f32 %v2705_v31, %v2838_v33  ;;  %v1920_v41 = vmul.f32 -1.442695, %v962_v40  ;;  %v1924_v31 = vmul.f32 -1.442695, %v982_v5 }
 0x333   : > { %2288 = vpow2.f32 %v1918_v22  ;;  %v1006_v40 = vadd.f32 %v2746_v53, %v2838_v33 }
 0x334   : > { %2113 = vmatprep.mubr.bf16.mxu0 %v1442_v18  ;;  %v1921_v18 = vmul.f32 -1.442695, %v966_v50  ;;  %v1922_v52 = vmul.f32 -1.442695, %v972_v61  ;;  %2290 = vpow2.f32 %v1919_v63  ;;  %v656_v50 = vsub.s32 2, %v2644_v47 }
 0x335   : > { %2114 = vmatmul.mubr.bf16.gmra.mrb[68].mxu0 %v1443_v4  ;;  %v976_v4 = vadd.f32 %v2710_v44, %v2838_v33  ;;  %2292 = vpow2.f32 %v1920_v41  ;;  %v1022_v61 = vadd.f32 %v2764_v26, %v2838_v33  ;;  %v1929_v63 = vmul.f32 -1.442695, %v1006_v40 }
 0x336   : > { %v2087_v29 = vpop.f32.mrb[40].mxu1  ;;  %2294 = vpow2.f32 %v1921_v18  ;;  %v1012_v47 = vadd.f32 %v2752_v34, %v2838_v33  ;;  %v1026_v26 = vadd.f32 %v2769_v59, %v2838_v33 }
 0x337   : > { %v1409_v46 = vpop.f32.mrb[41].mxu1  ;;  %v1923_v58 = vmul.f32 -1.442695, %v976_v4  ;;  %2296 = vpow2.f32 %v1922_v52  ;;  %v2868_v4 = vrot.slane %v2648_v49, %v656_v50  ;;  %v1932_v53 = vmul.f32 -1.442695, %v1022_v61 }
 0x338   : > { %v2088_v1 = vpop.f32.mrb[42].mxu1 }
 0x339   : > { %v1445_v8 = vpack.c.bf16 %v2088_v1, %v2087_v29  ;;  %v1412_v24 = vpop.f32.mrb[43].mxu1  ;;  %2298 = vpow2.f32 %v1923_v58  ;;  %v1925_v29 = vmul.f32 -1.442695, %v986_v12  ;;  %v1073_v18 = vadd.f32 %v2688_v11, %v2868_v4 }
 0x33a   : > { %v1444_v54 = vpack.c.bf16 %v1412_v24, %v1409_v46  ;;  %2300 = vpow2.f32 %v1924_v31  ;;  %v1065_v49 = vadd.f32 %v2668_v57, %v2868_v4  ;;  %v1016_v12 = vadd.f32 %v2759_v55, %v2838_v33 }
 0x33b   : > { %2302 = vpow2.f32 %v1925_v29  ;;  %v1076_v11 = vadd.f32 %v2698_v27, %v2868_v4  ;;  %v1092_v40 = vadd.f32 %v2726_v32, %v2868_v4  ;;  %v1097_v32 = vadd.f32 %v2733_v60, %v2868_v4 }
 0x33c   : > { %2117 = vmatprep.mubr.bf16.mxu1 %v1444_v54 }
 0x33d   : > { %2118 = vmatmul.mubr.bf16.vlgmr.msra.gmra.mrb[48].mxu1 %v1445_v8  ;;  %v2289_v44 = vpop.eup %2288 }
 0x33e   : > { %v2091_v35 = vpop.f32.mrb[44].mxu1  ;;  %v2291_v46 = vpop.eup %2290  ;;  %v1175_v24 = vadd.f32 1.0, %v2289_v44 }
 0x33f   : > { %v1425_v28 = vpop.f32.mrb[45].mxu1  ;;  %v2293_v1 = vpop.eup %2292 }
 0x340   : > { %v2092_v17 = vpop.f32.mrb[46].mxu1  ;;  %v2295_v8 = vpop.eup %2294  ;;  %v1177_v62 = vadd.f32 1.0, %v2293_v1  ;;  %2304 = vrcp.f32 %v1175_v24  ;;  %v1930_v1 = vmul.f32 -1.442695, %v1012_v47  ;;  %v1933_v24 = vmul.f32 -1.442695, %v1026_v26 }
 0x341   : > { %v1447_v51 = vpack.c.bf16 %v2092_v17, %v2091_v35  ;;  %v1428_v36 = vpop.f32.mrb[47].mxu1  ;;  %v2297_v54 = vpop.eup %2296  ;;  %v1176_v35 = vadd.f32 1.0, %v2291_v46  ;;  %v992_v17 = vadd.f32 %v2728_v37, %v2838_v33  ;;  %v1927_v37 = vmul.f32 -1.442695, %v996_v13 }
 0x342   : > { %v1446_v6 = vpack.c.bf16 %v1428_v36, %v1425_v28  ;;  %v1179_v36 = vadd.f32 1.0, %v2297_v54  ;;  %v1068_v46 = vadd.f32 %v2678_v2, %v2868_v4  ;;  %v1081_v2 = vadd.f32 %v2708_v43, %v2868_v4 }
 0x343   : > { %v2299_v28 = vpop.eup %2298  ;;  %2306 = vrcp.f32 %v1176_v35  ;;  %v1926_v39 = vmul.f32 -1.442695, %v992_v17  ;;  %v1931_v35 = vmul.f32 -1.442695, %v1016_v12 }
 0x344   : > { %2121 = vmatprep.mubr.bf16.mxu1 %v1446_v6  ;;  %v1002_v6 = vadd.f32 %v2740_v30, %v2838_v33  ;;  %v1180_v19 = vadd.f32 1.0, %v2299_v28  ;;  %v2301_v38 = vpop.eup %2300  ;;  %2308 = vrcp.f32 %v1177_v62  ;;  %v1084_v62 = vadd.f32 %v2715_v56, %v2868_v4 }
 0x345   : > { %2122 = vmatmul.mubr.bf16.gmra.mrb[52].mxu1 %v1447_v51  ;;  %v1178_v51 = vadd.f32 1.0, %v2295_v8  ;;  %v2303_v22 = vpop.eup %2302  ;;  %v1181_v30 = vadd.f32 1.0, %v2301_v38  ;;  %v2395_v38 = vld [vmem:[%s2459_s28 + $0x8] sm:$0xff] }
 0x346   : > { %v1928_v0 = vmul.f32 -1.442695, %v1002_v6  ;;  %v1182_v41 = vadd.f32 1.0, %v2303_v22  ;;  %v1089_v6 = vadd.f32 %v2721_v10, %v2868_v4 }
 0x347   : > { %2310 = vrcp.f32 %v1178_v51  ;;  %v2394_v51 = vld [vmem:[%s2459_s28] sm:$0xff] }
 0x348   : > { %2312 = vrcp.f32 %v1179_v36 }
 0x349   : > { %2314 = vrcp.f32 %v1180_v19 }
 0x34a   : > { %2316 = vpow2.f32 %v1926_v39  ;;  %v2874_v52 = vpop.eup %2304 }
 0x34b   : > { %2318 = vpow2.f32 %v1927_v37  ;;  %v1641_v13 = vmul.f32 %v2394_v51, %v2874_v52  ;;  %v1657_v36 = vsub.f32 1.0, %v2874_v52  ;;  %v2396_v37 = vld [vmem:[%s2459_s28 + $0x10] sm:$0xff] }
 0x34c   : > { %2320 = vpow2.f32 %v1928_v0 }
 0x34d   : > { %2322 = vrcp.f32 %v1181_v30  ;;  %v2880_v5 = vpop.eup %2306 }
 0x34e   : > { %2324 = vpow2.f32 %v1929_v63  ;;  %v2886_v29 = vpop.eup %2308  ;;  %v2907_v39 = vmul.f32 %v2395_v38, %v2880_v5  ;;  %v1658_v43 = vsub.f32 1.0, %v2880_v5  ;;  %v2397_v63 = vld [vmem:[%s2459_s28 + $0x18] sm:$0xff]  ;;  %v1100_v5 = vadd.f32 %v2738_v15, %v2868_v4 }
 0x34f   : > { %2326 = vrcp.f32 %v1182_v41  ;;  %v1643_v22 = vmul.f32 %v2396_v37, %v2886_v29  ;;  %v1659_v10 = vsub.f32 1.0, %v2886_v29 }
 0x350   : > { %2328 = vpow2.f32 %v1932_v53 }
 0x351   : > { %v2890_v57 = vpop.eup %2310 }
 0x352   : > { %v2892_v33 = vpop.eup %2312  ;;  %v1644_v41 = vmul.f32 %v2397_v63, %v2890_v57  ;;  %v1660_v53 = vsub.f32 1.0, %v2890_v57 }
 0x353   : > { %v2894_v54 = vpop.eup %2314 }
 0x354   : > { %v2317_v28 = vpop.eup %2316 }
 0x355   : > { %v2319_v17 = vpop.eup %2318 }
 0x356   : > { %v2321_v19 = vpop.eup %2320 }
 0x357   : > { %v2912_v50 = vpop.eup %2322  ;;  %v1185_v26 = vadd.f32 1.0, %v2321_v19 }
 0x358   : > { %v2325_v30 = vpop.eup %2324 }
 0x359   : > { %v2922_v52 = vpop.eup %2326  ;;  %v1186_v60 = vadd.f32 1.0, %v2325_v30 }
 0x35a   : > { %v2329_v12 = vpop.eup %2328 }
 0x400   : > { %v2111_v58 = vpop.f32.mrb[64].mxu0 }
 0x401   : > { %v1611_v34 = vadd.f32 %v2111_v58, %v1073_v18  ;;  %v1546_v31 = vpop.f32.mrb[65].mxu0 }
 0x402   : > { %v1609_v44 = vadd.f32 %v1546_v31, %v1065_v49  ;;  %v2112_v59 = vpop.f32.mrb[66].mxu0 }
 0x403   : > { %2330 = vtanh.f32 %v1611_v34  ;;  %v1612_v8 = vadd.f32 %v2112_v59, %v1076_v11  ;;  %v1549_v55 = vpop.f32.mrb[67].mxu0  ;;  %v2398_v34 = vld [vmem:[%s2459_s28 + $0x20] sm:$0xff]  ;;  %v1183_v11 = vadd.f32 1.0, %v2317_v28  ;;  %v1661_v59 = vsub.f32 1.0, %v2892_v33 }
 0x404   : > { %2332 = vtanh.f32 %v1609_v44  ;;  %v1610_v27 = vadd.f32 %v1549_v55, %v1068_v46  ;;  %v2928_v31 = vmul.f32 %v2398_v34, %v2892_v33  ;;  %v1105_v46 = vadd.f32 %v2744_v48, %v2868_v4  ;;  %v2998_v34 = vld [vmem:[#allocation11_spill] sm:$0xff] }
 0x405   : > { %2334 = vtanh.f32 %v1612_v8  ;;  %v1108_v8 = vadd.f32 %v2750_v14, %v2868_v4  ;;  %v1662_v33 = vsub.f32 1.0, %v2894_v54  ;;  %v1647_v48 = vmul.f32 %v2777_v25, %v2912_v50 }
 0x406   : > { %2336 = vtanh.f32 %v1610_v27 }
 0x407   : > { %2338 = vpow2.f32 %v1930_v1  ;;  %v1184_v1 = vadd.f32 1.0, %v2319_v17 }
 0x408   : > { %2340 = vpow2.f32 %v1933_v24  ;;  %v2115_v56 = vpop.f32.mrb[68].mxu0  ;;  %v2399_v24 = vld [vmem:[%s2459_s28 + $0x28] sm:$0xff] }
 0x409   : > { %2342 = vpow2.f32 %v1931_v35  ;;  %v1615_v0 = vadd.f32 %v2115_v56, %v1089_v6  ;;  %v1562_v61 = vpop.f32.mrb[69].mxu0  ;;  %v2937_v27 = vmul.f32 %v2399_v24, %v2894_v54  ;;  %v1663_v56 = vsub.f32 1.0, %v2912_v50 }
 0x40a   : > { %v1613_v47 = vadd.f32 %v1562_v61, %v1081_v2  ;;  %v2116_v18 = vpop.f32.mrb[70].mxu0 }
 0x40b   : > { %2344 = vtanh.f32 %v1615_v0  ;;  %v1616_v58 = vadd.f32 %v2116_v18, %v1092_v40  ;;  %v1565_v49 = vpop.f32.mrb[71].mxu0 }
 0x40c   : > { %2346 = vtanh.f32 %v1613_v47  ;;  %v1614_v29 = vadd.f32 %v1565_v49, %v1084_v62  ;;  %v2997_v49 = vld [vmem:[#allocation12_spill] sm:$0xff] }
 0x40d   : > { %v2331_v44 = vpop.eup %2330  ;;  %2348 = vtanh.f32 %v1616_v58 }
 0x40e   : > { %v2333_v57 = vpop.eup %2332  ;;  %v1675_v15 = vmul.f32 %v2331_v44, %v1659_v10  ;;  %2350 = vtanh.f32 %v1614_v29 }
 0x40f   : > { %v2335_v55 = vpop.eup %2334  ;;  %2352 = vrcp.f32 %v1185_v26  ;;  %v1673_v35 = vmul.f32 %v2333_v57, %v1657_v36  ;;  %v1664_v26 = vsub.f32 1.0, %v2922_v52  ;;  %v1124_v57 = vadd.f32 %v2780_v45, %v2868_v4 }
 0x410   : > { %v2337_v28 = vpop.eup %2336  ;;  %2354 = vrcp.f32 %v1183_v11  ;;  %v1691_v2 = vadd.f32 %v1675_v15, %v1643_v22  ;;  %v1676_v62 = vmul.f32 %v2335_v55, %v1660_v53  ;;  %v2119_v17 = vpop.f32.mrb[48].mxu1  ;;  %v1189_v22 = vadd.f32 1.0, %v2329_v12  ;;  %v2996_v53 = vld [vmem:[#allocation9_spill] sm:$0xff] }
 0x411   : > { %v2339_v14 = vpop.eup %2338  ;;  %2356 = vrcp.f32 %v1186_v60  ;;  %v1689_v51 = vadd.f32 %v1673_v35, %v1641_v13  ;;  %v1674_v6 = vmul.f32 %v2337_v28, %v1658_v43  ;;  %v1619_v19 = vadd.f32 %v2119_v17, %v1105_v46  ;;  %v1578_v38 = vpop.f32.mrb[49].mxu1 }
 0x412   : > { %v2341_v36 = vpop.eup %2340  ;;  %2358 = vrcp.f32 %v1184_v1  ;;  %1707 = vst [vmem:[%s2474_s15 + $0x10] sm:$0xff] %v1691_v2  ;;  %v1692_v54 = vadd.f32 %v1676_v62, %v1644_v41  ;;  %v1617_v40 = vadd.f32 %v1578_v38, %v1097_v32  ;;  %v2120_v25 = vpop.f32.mrb[50].mxu1  ;;  %v1187_v0 = vadd.f32 1.0, %v2339_v14 }
 0x413   : > { %v2343_v37 = vpop.eup %2342  ;;  %1705 = vst [vmem:[%s2474_s15] sm:$0xff] %v1689_v51  ;;  %v1690_v10 = vadd.f32 %v1674_v6, %v2907_v39  ;;  %2360 = vtanh.f32 %v1619_v19  ;;  %v1620_v13 = vadd.f32 %v2120_v25, %v1108_v8  ;;  %v1581_v43 = vpop.f32.mrb[51].mxu1  ;;  %v1190_v41 = vadd.f32 1.0, %v2341_v36 }
 0x414   : > { %1708 = vst [vmem:[%s2474_s15 + $0x18] sm:$0xff] %v1692_v54  ;;  %v1722_v61 = vpack.c.bf16 %v1692_v54, %v1691_v2  ;;  %2362 = vtanh.f32 %v1617_v40  ;;  %v1618_v30 = vadd.f32 %v1581_v43, %v1100_v5  ;;  %v1113_v47 = vadd.f32 %v2996_v53, %v2868_v4 }
 0x415   : > { %v2345_v63 = vpop.eup %2344  ;;  %1706 = vst [vmem:[%s2474_s15 + $0x8] sm:$0xff] %v1690_v10  ;;  %v1721_v50 = vpack.c.bf16 %v1690_v10, %v1689_v51  ;;  %2364 = vtanh.f32 %v1620_v13  ;;  %v1188_v32 = vadd.f32 1.0, %v2343_v37  ;;  %v1648_v12 = vmul.f32 %v2997_v49, %v2922_v52 }
 0x416   : > { %v2347_v18 = vpop.eup %2346  ;;  %1730 = vst [vmem:[#allocation3 + $0x10] sm:$0xff] %v1722_v61  ;;  %v1679_v39 = vmul.f32 %v2345_v63, %v1663_v56  ;;  %2366 = vtanh.f32 %v1618_v30  ;;  %v1121_v11 = vadd.f32 %v2998_v34, %v2868_v4 }
 0x417   : > { %v2349_v58 = vpop.eup %2348  ;;  %2368 = vrcp.f32 %v1189_v22  ;;  %1729 = vst [vmem:[#allocation3] sm:$0xff] %v1721_v50  ;;  %v1677_v5 = vmul.f32 %v2347_v18, %v1661_v59 }
 0x418   : > { %v2351_v29 = vpop.eup %2350  ;;  %2370 = vrcp.f32 %v1187_v0  ;;  %v1695_v44 = vadd.f32 %v1679_v39, %v1647_v48  ;;  %v1680_v60 = vmul.f32 %v2349_v58, %v1664_v26  ;;  %v2123_v46 = vpop.f32.mrb[52].mxu1  ;;  %v2999_v48 = vld [vmem:[#allocation10_spill] sm:$0xff] }
 0x419   : > { %v2353_v1 = vpop.eup %2352  ;;  %2372 = vrcp.f32 %v1190_v41  ;;  %v1693_v52 = vadd.f32 %v1677_v5, %v2928_v31  ;;  %v1678_v15 = vmul.f32 %v2351_v29, %v1662_v33  ;;  %v1623_v8 = vadd.f32 %v2123_v46, %v1121_v11  ;;  %v1594_v59 = vpop.f32.mrb[53].mxu1 }
 0x41a   : > { %v2355_v55 = vpop.eup %2354  ;;  %2374 = vrcp.f32 %v1188_v32  ;;  %1711 = vst [vmem:[%s2474_s15 + $0x30] sm:$0xff] %v1695_v44  ;;  %v1696_v24 = vadd.f32 %v1680_v60, %v1648_v12  ;;  %v1621_v35 = vadd.f32 %v1594_v59, %v1113_v47  ;;  %v2124_v28 = vpop.f32.mrb[54].mxu1  ;;  %v1116_v2 = vadd.f32 %v2999_v48, %v2868_v4 }
 0x41b   : > { %v2357_v62 = vpop.eup %2356  ;;  %1709 = vst [vmem:[%s2474_s15 + $0x20] sm:$0xff] %v1693_v52  ;;  %v1694_v45 = vadd.f32 %v1678_v15, %v2937_v27  ;;  %2376 = vtanh.f32 %v1623_v8  ;;  %v1624_v31 = vadd.f32 %v2124_v28, %v1124_v57  ;;  %v1597_v33 = vpop.f32.mrb[55].mxu1  ;;  %v1667_v51 = vsub.f32 1.0, %v2353_v1 }
 0x41c   : > { %v2359_v17 = vpop.eup %2358  ;;  %1712 = vst [vmem:[%s2474_s15 + $0x38] sm:$0xff] %v1696_v24  ;;  %v1724_v14 = vpack.c.bf16 %v1696_v24, %v1695_v44  ;;  %2378 = vtanh.f32 %v1621_v35  ;;  %v1622_v6 = vadd.f32 %v1597_v33, %v1116_v2  ;;  %v1665_v36 = vsub.f32 1.0, %v2355_v55 }
 0x41d   : > { %v2361_v19 = vpop.eup %2360  ;;  %1710 = vst [vmem:[%s2474_s15 + $0x28] sm:$0xff] %v1694_v45  ;;  %v1723_v38 = vpack.c.bf16 %v1694_v45, %v1693_v52  ;;  %2380 = vtanh.f32 %v1624_v31  ;;  %v1651_v4 = vmul.f32 %v2791_v21, %v2353_v1  ;;  %v1668_v27 = vsub.f32 1.0, %v2357_v62 }
 0x41e   : > { %v2363_v54 = vpop.eup %2362  ;;  %1732 = vst [vmem:[#allocation3 + $0x30] sm:$0xff] %v1724_v14  ;;  %v1683_v56 = vmul.f32 %v2361_v19, %v1667_v51  ;;  %2382 = vtanh.f32 %v1622_v6  ;;  %v1649_v25 = vmul.f32 %v2783_v3, %v2355_v55  ;;  %v1666_v22 = vsub.f32 1.0, %v2359_v17 }
 0x41f   : > { %v2365_v40 = vpop.eup %2364  ;;  %1731 = vst [vmem:[#allocation3 + $0x20] sm:$0xff] %v1723_v38  ;;  %v1681_v37 = vmul.f32 %v2363_v54, %v1665_v36  ;;  %v1652_v13 = vmul.f32 %v2795_v20, %v2357_v62  ;;  %v1650_v61 = vmul.f32 %v2787_v9, %v2359_v17 }
 0x420   : > { %v2367_v10 = vpop.eup %2366  ;;  %v1699_v43 = vadd.f32 %v1683_v56, %v1651_v4  ;;  %v1684_v0 = vmul.f32 %v2365_v40, %v1668_v27 }
 0x421   : > { %v2369_v21 = vpop.eup %2368  ;;  %v1697_v30 = vadd.f32 %v1681_v37, %v1649_v25  ;;  %v1682_v63 = vmul.f32 %v2367_v10, %v1666_v22 }
 0x422   : > { %v2371_v41 = vpop.eup %2370  ;;  %1715 = vst [vmem:[%s2474_s15 + $0x50] sm:$0xff] %v1699_v43  ;;  %v1700_v50 = vadd.f32 %v1684_v0, %v1652_v13  ;;  %v1671_v32 = vsub.f32 1.0, %v2369_v21  ;;  %v1655_v49 = vmul.f32 %v2807_v23, %v2369_v21 }
 0x423   : > { %v2373_v3 = vpop.eup %2372  ;;  %1713 = vst [vmem:[%s2474_s15 + $0x40] sm:$0xff] %v1697_v30  ;;  %v1698_v53 = vadd.f32 %v1682_v63, %v1650_v61  ;;  %v1669_v26 = vsub.f32 1.0, %v2371_v41  ;;  %v1653_v34 = vmul.f32 %v2799_v7, %v2371_v41 }
 0x424   : > { %v2375_v47 = vpop.eup %2374  ;;  %1716 = vst [vmem:[%s2474_s15 + $0x58] sm:$0xff] %v1700_v50  ;;  %v1726_v18 = vpack.c.bf16 %v1700_v50, %v1699_v43  ;;  %v1672_v12 = vsub.f32 1.0, %v2373_v3  ;;  %v1656_v60 = vmul.f32 %v2811_v42, %v2373_v3 }
 0x425   : > { %v2377_v39 = vpop.eup %2376  ;;  %1714 = vst [vmem:[%s2474_s15 + $0x48] sm:$0xff] %v1698_v53  ;;  %v1725_v20 = vpack.c.bf16 %v1698_v53, %v1697_v30  ;;  %v1670_v29 = vsub.f32 1.0, %v2375_v47  ;;  %v1654_v23 = vmul.f32 %v2803_v16, %v2375_v47 }
 0x426   : > { %v2379_v58 = vpop.eup %2378  ;;  %1734 = vst [vmem:[#allocation3 + $0x50] sm:$0xff] %v1726_v18  ;;  %v1687_v9 = vmul.f32 %v2377_v39, %v1671_v32 }
 0x427   : > { %v2381_v5 = vpop.eup %2380  ;;  %1733 = vst [vmem:[#allocation3 + $0x40] sm:$0xff] %v1725_v20  ;;  %v1685_v11 = vmul.f32 %v2379_v58, %v1669_v26 }
 0x428   : > { %v2383_v44 = vpop.eup %2382  ;;  %v1703_v46 = vadd.f32 %v1687_v9, %v1655_v49  ;;  %v1688_v57 = vmul.f32 %v2381_v5, %v1672_v12 }
 0x429   : > { %v1701_v1 = vadd.f32 %v1685_v11, %v1653_v34  ;;  %v1686_v52 = vmul.f32 %v2383_v44, %v1670_v29 }
 0x42a   : > { %1719 = vst [vmem:[%s2474_s15 + $0x70] sm:$0xff] %v1703_v46  ;;  %v1704_v15 = vadd.f32 %v1688_v57, %v1656_v60 }
 0x42b   : > { %1717 = vst [vmem:[%s2474_s15 + $0x60] sm:$0xff] %v1701_v1  ;;  %v1702_v8 = vadd.f32 %v1686_v52, %v1654_v23 }
 0x42c   : > { %1720 = vst [vmem:[%s2474_s15 + $0x78] sm:$0xff] %v1704_v15  ;;  %v1728_v59 = vpack.c.bf16 %v1704_v15, %v1703_v46 }
 0x42d   : > { %1718 = vst [vmem:[%s2474_s15 + $0x68] sm:$0xff] %v1702_v8  ;;  %v1727_v7 = vpack.c.bf16 %v1702_v8, %v1701_v1 }
 0x42e   : > { %1736 = vst [vmem:[#allocation3 + $0x70] sm:$0xff] %v1728_v59 }
 0x42f   : > { %1735 = vst [vmem:[#allocation3 + $0x60] sm:$0xff] %v1727_v7 }
 0x430 PF: > { %s16_s21 = sadd.s32 1, %s2410_s21  }
 0x431   : > { %p13_p5 = scmp.ge.s32.totalorder %s16_s21, 4  }
 0x433   :  { %15 = sbr.rel (!%p13_p5) target bundleno = 1 (0x1), region = 165 }
 0x43a   :  { %1758 = vsyncmov [#allocation4] }
 0x43d   :  { %s1759_s28 = vpop.sfrf %1758 }
 0x43e   :  { %p1960_p6 = scmp.ne.s32.totalorder %s1759_s28, 0 }
 0x440   :  { %1763 = shalt.err (%p1960_p6)  }
 0x441   :  { %1765 = vsyncmov [#allocation4 + $0x1] }
 0x444   :  { %s1766_s8 = vpop.sfrf %1765 }
 0x445   :  { %p1961_p7 = scmp.ne.s32.totalorder %s1766_s8, 0 }
 0x447   :  { %1770 = shalt.err (%p1961_p7)  }

</bundles_post_ra>
